<compile_context>
chip_gen: v6e
topology: v6e:2x2x1
jax: 0.10.0
libtpu: 0.0.40
codegen_flags: <defaults>
</compile_context>

<pallas_src>
import jax
import jax.numpy as jnp
from jax.experimental import pallas as pl
from jax.experimental.pallas import tpu as pltpu

NEG_SLOPE = 0.01  # nn.LeakyReLU default negative_slope
OUT_LANES = 128   # lane-dense packed output width (xrec|mean|logvar|z + zero pad)

_WEIGHT_NAMES = ("fc_w", "wih1", "whh1", "wih2", "whh2",
                 "we1", "we2", "wmv", "wd1", "wd2", "wdo")
_BIAS_NAMES = ("fc_b", "b1", "b2", "be1", "be2", "bmv", "bd1", "bd2", "bdo")


def _leaky(v):
    return jnp.where(v > 0, v, NEG_SLOPE * v)


def _round8(n):
    return -(-n // 8) * 8


# ----------------------------------------------------------------------------
# Host-side parameter packing: 21 tiny arrays -> 2 slabs (2 DMAs).
# ----------------------------------------------------------------------------
def pack_params(p):
    cols = max(p[n].shape[1] for n in _WEIGHT_NAMES + _BIAS_NAMES)   # 64 here
    w_layout, off = {}, 0
    for n in _WEIGHT_NAMES:
        k, c = p[n].shape
        w_layout[n] = (off, k, c)
        off += _round8(k)                     # each weight starts on a sublane tile
    w_slab = jnp.zeros((_round8(off), cols), jnp.float32)
    for n in _WEIGHT_NAMES:
        o, k, c = w_layout[n]
        w_slab = w_slab.at[o:o + k, :c].set(p[n])

    b_layout = {}
    b_slab = jnp.zeros((_round8(len(_BIAS_NAMES)), cols), jnp.float32)
    for r, n in enumerate(_BIAS_NAMES):
        c = p[n].shape[1]
        b_layout[n] = (r, c)
        b_slab = b_slab.at[r, :c].set(p[n][0])
    return w_slab, b_slab, w_layout, b_layout


# ----------------------------------------------------------------------------
# Pallas wrapper: grid over batch blocks, whole forward fused in one kernel.
# ----------------------------------------------------------------------------
def factorvae_forward(x, eps, p, nb_features, block_b=8):
    """x: [B, T, F_total]  (B independent instances of the module's 2-D forward),
    eps: [B, T, latent].  Returns (xrec, mean, logvar, z), each [B, T, .]."""
    B, T, f_total = x.shape
    latent = eps.shape[2]
    d_in = f_total - nb_features

    fc_out = p["fc_w"].shape[1]
    H1 = p["whh1"].shape[0]
    H2 = p["whh2"].shape[0]
    enc_hid = p["we1"].shape[1]
    dec_hid = p["wd1"].shape[1]
    dec_out = p["wdo"].shape[1]
    out_w = dec_out + 3 * latent
    assert out_w <= OUT_LANES
    block_b = min(block_b, B)
    assert B % block_b == 0 and block_b % 8 == 0, \
        "block_b must divide B and be a multiple of 8 (sublane tile)"

    w_slab, b_slab, w_layout, b_layout = pack_params(p)

    def kernel(x_ref, eps_ref, w_ref, b_ref, out_ref):
        f32 = jnp.float32
        bb = block_b
        M = T * bb

        def W(name):
            o, k, c = w_layout[name]
            return w_ref[o:o + k, 0:c]

        def Bv(name):
            r, c = b_layout[name]
            return b_ref[r:r + 1, 0:c]

        def mm(a, w):
            return jnp.dot(a, w, preferred_element_type=f32)

        # time-major rows: row index = t*bb + b  (bb is a sublane-tile multiple,
        # so this reshape is layout-preserving).
        xx = x_ref[...].reshape(M, f_total)
        xt1 = xx[:, :d_in]
        xT = xx[:, d_in:]
        ee = eps_ref[...].reshape(M, latent)

        # ---- PreVAELSTM.fc : Linear + Dropout(identity) + LeakyReLU ---------
        fc = _leaky(mm(xt1, W("fc_w")) + Bv("fc_b"))

        def lstm_sweep(seq, wih, whh, bias, H):
            # input projection hoisted out of the recurrence: one [M,.]@[.,4H]
            xproj = mm(seq, W(wih)) + Bv(bias)            # (M, 4H)
            whh_w = W(whh)                                # resident across steps
            h = jnp.zeros((bb, H), f32)
            c = jnp.zeros((bb, H), f32)
            rows = []
            for t in range(T):                            # static unroll; only h@whh serial
                g = xproj[t * bb:(t + 1) * bb, :] + mm(h, whh_w)
                sg = jax.nn.sigmoid(g)                    # i | f | . | o in one EUP pass
                i, f, o = sg[:, 0:H], sg[:, H:2 * H], sg[:, 3 * H:4 * H]
                gg = jnp.tanh(g[:, 2 * H:3 * H])
                c = f * c + i * gg
                h = o * jnp.tanh(c)
                rows.append(h)
            return jnp.concatenate(rows, axis=0)          # (M, H), time-major

        # TODO(synk): when loading real torch LSTM weights, sum bias_ih + bias_hh
        # into the single per-layer bias row used here.
        h1_seq = lstm_sweep(fc, "wih1", "whh1", "b1", H1)
        out_lstm = lstm_sweep(h1_seq, "wih2", "whh2", "b2", H2)

        # ---- FactorEncoder (use_LSTM=True): cat((out_lstm, xT), 1) ----------
        enc_in = jnp.concatenate([out_lstm, xT], axis=1)
        eh = _leaky(mm(enc_in, W("we1")) + Bv("be1"))
        eh = _leaky(mm(eh, W("we2")) + Bv("be2"))
        mv = mm(eh, W("wmv")) + Bv("bmv")                 # fused mean|logvar matmul
        mean = mv[:, :latent]
        logvar = mv[:, latent:]

        # ---- reparametrize: z = mean + exp(logvar)**0.5 * eps ----------------
        z = mean + jnp.exp(0.5 * logvar) * ee

        # ---- FactorDecoder: cat((out_lstm, z), 1) ----------------------------
        dec_in = jnp.concatenate([out_lstm, z], axis=1)
        dh = _leaky(mm(dec_in, W("wd1")) + Bv("bd1"))
        dh = _leaky(mm(dh, W("wd2")) + Bv("bd2"))
        xrec = jax.nn.sigmoid(mm(dh, W("wdo")) + Bv("bdo"))

        # Single packed, 128-lane-dense output store (one unmasked vst / DMA).
        packed = jnp.concatenate(
            [xrec, mean, logvar, z, jnp.zeros((M, OUT_LANES - out_w), f32)], axis=1)
        out_ref[...] = packed.reshape(T, bb, OUT_LANES)

    # Time-major so each grid block is one contiguous (T, block_b, .) slab and the
    # per-step recurrence slice is a static sublane-aligned row range.
    x_tm = jnp.transpose(x, (1, 0, 2))
    eps_tm = jnp.transpose(eps, (1, 0, 2))

    macs = (d_in * fc_out + fc_out * 4 * H1 + H1 * 4 * H1
            + H1 * 4 * H2 + H2 * 4 * H2
            + (H2 + nb_features) * enc_hid + enc_hid * enc_hid
            + enc_hid * 2 * latent
            + (H2 + latent) * dec_hid + dec_hid * dec_hid + dec_hid * dec_out)
    cost = pl.CostEstimate(
        flops=2 * B * T * macs,
        transcendentals=B * T * (6 * H1 + 6 * H2 + latent + dec_out),
        bytes_accessed=4 * (x.size + eps.size + w_slab.size + b_slab.size
                            + T * B * OUT_LANES),
    )

    # NOTE: per-block working set is a few hundred KiB, far below even v7x's scoped
    # VMEM; raise vmem_limit_bytes only if block_b is pushed aggressively.
    out_tm = pl.pallas_call(
        kernel,
        grid=(B // block_b,),
        in_specs=[
            pl.BlockSpec((T, block_b, f_total), lambda i: (0, i, 0)),
            pl.BlockSpec((T, block_b, latent), lambda i: (0, i, 0)),
            pl.BlockSpec(w_slab.shape, lambda i: (0, 0)),   # resident across grid
            pl.BlockSpec(b_slab.shape, lambda i: (0, 0)),   # resident across grid
        ],
        out_specs=pl.BlockSpec((T, block_b, OUT_LANES), lambda i: (0, i, 0)),
        out_shape=jax.ShapeDtypeStruct((T, B, OUT_LANES), jnp.float32),
        compiler_params=pltpu.CompilerParams(dimension_semantics=("parallel",)),
        cost_estimate=cost,
    )(x_tm, eps_tm, w_slab, b_slab)

    out = jnp.transpose(out_tm, (1, 0, 2))                  # [B, T, OUT_LANES]
    xrec = out[:, :, :dec_out]
    mean = out[:, :, dec_out:dec_out + latent]
    logvar = out[:, :, dec_out + latent:dec_out + 2 * latent]
    z = out[:, :, dec_out + 2 * latent:out_w]
    return xrec, mean, logvar, z


# ----------------------------------------------------------------------------
# Deterministic parameter construction + pure-JAX reference (per sequence)
# ----------------------------------------------------------------------------
def _xavier(key, shape):
    std = (2.0 / (shape[0] + shape[1])) ** 0.5
    return (std * jax.random.normal(key, shape)).astype(jnp.float32)


def make_params(key, d_in, fc_out, H1, H2, nb_features, enc_hid, latent,
                dec_hid, dec_out):
    ks = jax.random.split(key, 11)
    z = lambda n: jnp.zeros((1, n), jnp.float32)
    return {
        "fc_w": _xavier(ks[0], (d_in, fc_out)), "fc_b": z(fc_out),
        "wih1": _xavier(ks[1], (fc_out, 4 * H1)),
        "whh1": _xavier(ks[2], (H1, 4 * H1)), "b1": z(4 * H1),
        "wih2": _xavier(ks[3], (H1, 4 * H2)),
        "whh2": _xavier(ks[4], (H2, 4 * H2)), "b2": z(4 * H2),
        "we1": _xavier(ks[5], (H2 + nb_features, enc_hid)), "be1": z(enc_hid),
        "we2": _xavier(ks[6], (enc_hid, enc_hid)), "be2": z(enc_hid),
        "wmv": _xavier(ks[7], (enc_hid, 2 * latent)), "bmv": z(2 * latent),
        "wd1": _xavier(ks[8], (H2 + latent, dec_hid)), "bd1": z(dec_hid),
        "wd2": _xavier(ks[9], (dec_hid, dec_hid)), "bd2": z(dec_hid),
        "wdo": _xavier(ks[10], (dec_hid, dec_out)), "bdo": z(dec_out),
    }


def reference_forward(x, eps, p, nb_features):
    """Pure-JAX reference for a single [T, F_total] instance (default precision)."""
    T, F_total = x.shape
    xt1 = x[:, :F_total - nb_features]
    xT = x[:, F_total - nb_features:]
    H1 = p["whh1"].shape[0]
    H2 = p["whh2"].shape[0]
    latent = eps.shape[1]

    fc = _leaky(xt1 @ p["fc_w"] + p["fc_b"])

    def cell(x_t, h, c, wih, whh, b, H):
        g = x_t @ wih + h @ whh + b
        i = jax.nn.sigmoid(g[:, 0:H]); f = jax.nn.sigmoid(g[:, H:2 * H])
        gg = jnp.tanh(g[:, 2 * H:3 * H]); o = jax.nn.sigmoid(g[:, 3 * H:4 * H])
        c = f * c + i * gg
        return o * jnp.tanh(c), c

    h1 = jnp.zeros((1, H1), jnp.float32); c1 = jnp.zeros((1, H1), jnp.float32)
    h1_rows = []
    for t in range(T):
        h1, c1 = cell(fc[t:t + 1], h1, c1, p["wih1"], p["whh1"], p["b1"], H1)
        h1_rows.append(h1)
    h1_seq = jnp.concatenate(h1_rows, axis=0)

    h2 = jnp.zeros((1, H2), jnp.float32); c2 = jnp.zeros((1, H2), jnp.float32)
    h2_rows = []
    for t in range(T):
        h2, c2 = cell(h1_seq[t:t + 1], h2, c2, p["wih2"], p["whh2"], p["b2"], H2)
        h2_rows.append(h2)
    out_lstm = jnp.concatenate(h2_rows, axis=0)

    enc_in = jnp.concatenate([out_lstm, xT], axis=1)
    eh = _leaky(enc_in @ p["we1"] + p["be1"])
    eh = _leaky(eh @ p["we2"] + p["be2"])
    mv = eh @ p["wmv"] + p["bmv"]
    mean = mv[:, :latent]
    logvar = mv[:, latent:]
    zz = mean + jnp.exp(0.5 * logvar) * eps
    dec_in = jnp.concatenate([out_lstm, zz], axis=1)
    dh = _leaky(dec_in @ p["wd1"] + p["bd1"])
    dh = _leaky(dh @ p["wd2"] + p["bd2"])
    xrec = jax.nn.sigmoid(dh @ p["wdo"] + p["bdo"])
    return xrec, mean, logvar, zz


if __name__ == "__main__":
    # Per-sequence configuration consistent with the module's forward.
    T = 8                 # rows of x (torch treats these as the LSTM sequence length)
    NB_FEATURES = 8
    D_IN = 16             # xt_1 feature dim == PreVAELSTM fc_input_dim
    F_TOTAL = D_IN + NB_FEATURES           # 24
    FC_OUT = 16           # PreVAELSTM fc_output_dim == lstm_1 input size
    H1, H2 = 16, 16       # LSTM hidden dims (num_layers=1, unidirectional)
    ENC_HID = (H2 + NB_FEATURES) // 2 + 1  # 13 (expansion_factor=2)
    LATENT = 8            # FactorEncoder fc_output_dim
    DEC_HID = (H2 + LATENT) * 2            # 48 (expansion_factor=2)
    DEC_OUT = F_TOTAL     # FactorDecoder fc_output_dim

    B = 16                # independent sequences batched per pallas_call
    BLOCK_B = 8           # sequences per grid step (parallel axis)

    key = jax.random.PRNGKey(0)
    kx, keps, kp = jax.random.split(key, 3)
    x = jax.random.normal(kx, (B, T, F_TOTAL), jnp.float32)
    # TODO(synk): torch.randn inside reparametrize is generated host-side here and
    # passed in; an in-kernel pltpu.prng_* path would avoid the extra input DMA.
    eps = jax.random.normal(keps, (B, T, LATENT), jnp.float32)

    params = make_params(kp, D_IN, FC_OUT, H1, H2, NB_FEATURES, ENC_HID,
                         LATENT, DEC_HID, DEC_OUT)

    xrec, mean, logvar, z = jax.block_until_ready(
        factorvae_forward(x, eps, params, NB_FEATURES, block_b=BLOCK_B))

    xrec_r, mean_r, logvar_r, z_r = jax.vmap(
        lambda xb, eb: reference_forward(xb, eb, params, NB_FEATURES))(x, eps)

    # Both sides run default matmul precision (bf16 MXU passes, f32 accumulation);
    # tolerance re-derived accordingly (values are O(0.1-1), per-layer error ~1e-3).
    for got, want in ((xrec, xrec_r), (mean, mean_r), (logvar, logvar_r), (z, z_r)):
        assert got.shape == want.shape, (got.shape, want.shape)
        assert jnp.allclose(got, want, rtol=2e-2, atol=2e-2), \
            f"mismatch vs reference, max |diff| = {float(jnp.max(jnp.abs(got - want)))}"

    print("KERNEL_OK")
</pallas_src>

<mosaic_0001>
module attributes {stable_mosaic.version = 11 : i64} {
  func.func @kernel(%arg0: i32, %arg1: memref<8x8x24xf32, #tpu.memory_space<vmem>>, %arg2: memref<8x8x8xf32, #tpu.memory_space<vmem>>, %arg3: memref<256x64xf32, #tpu.memory_space<vmem>>, %arg4: memref<16x64xf32, #tpu.memory_space<vmem>>, %arg5: memref<8x8x128xf32, #tpu.memory_space<vmem>>) attributes {dimension_semantics = [#tpu.dimension_semantics<parallel>], iteration_bounds = array<i64: 2>, scalar_prefetch = 0 : i64, scratch_operands = 0 : i64, tpu.core_type = #tpu.core_type<tc>, window_params = [{transform_indices = @transform_0, window_bounds = array<i64: 8, 8, 24>}, {transform_indices = @transform_1, window_bounds = array<i64: 8, 8, 8>}, {pipeline_mode = #tpu.pipeline_mode<synchronous>, transform_indices = @transform_2, window_bounds = array<i64: 256, 64>}, {pipeline_mode = #tpu.pipeline_mode<synchronous>, transform_indices = @transform_3, window_bounds = array<i64: 16, 64>}, {transform_indices = @transform_4, window_bounds = array<i64: 8, 8, 128>}]} {
    %c0 = arith.constant 0 : index
    %c0_0 = arith.constant 0 : index
    %c0_1 = arith.constant 0 : index
    %0 = vector.load %arg1[%c0, %c0_0, %c0_1] : memref<8x8x24xf32, #tpu.memory_space<vmem>>, vector<8x8x24xf32>
    %1 = vector.shape_cast %0 : vector<8x8x24xf32> to vector<64x24xf32>
    %2 = vector.extract_strided_slice %1 {offsets = [0, 0], sizes = [64, 16], strides = [1, 1]} : vector<64x24xf32> to vector<64x16xf32>
    %3 = vector.extract_strided_slice %1 {offsets = [0, 16], sizes = [64, 8], strides = [1, 1]} : vector<64x24xf32> to vector<64x8xf32>
    %c0_2 = arith.constant 0 : index
    %c0_3 = arith.constant 0 : index
    %c0_4 = arith.constant 0 : index
    %4 = vector.load %arg2[%c0_2, %c0_3, %c0_4] : memref<8x8x8xf32, #tpu.memory_space<vmem>>, vector<8x8x8xf32>
    %5 = vector.shape_cast %4 : vector<8x8x8xf32> to vector<64x8xf32>
    %c0_5 = arith.constant 0 : index
    %c0_6 = arith.constant 0 : index
    %6 = vector.load %arg3[%c0_5, %c0_6] : memref<256x64xf32, #tpu.memory_space<vmem>>, vector<16x16xf32>
    %cst = arith.constant dense<0.000000e+00> : vector<64x16xf32>
    %7 = tpu.matmul %2, %6, %cst {dimension_numbers = #tpu.dot_dimension_numbers<[1], [0], [0], [1], [0, 0, 1, 1], [], []>} : vector<64x16xf32>, vector<16x16xf32>, vector<64x16xf32> -> vector<64x16xf32>
    %c0_7 = arith.constant 0 : index
    %c0_8 = arith.constant 0 : index
    %8 = vector.load %arg4[%c0_7, %c0_8] : memref<16x64xf32, #tpu.memory_space<vmem>>, vector<1x16xf32>
    %9 = vector.broadcast %8 : vector<1x16xf32> to vector<64x16xf32>
    %10 = arith.addf %7, %9 : vector<64x16xf32>
    %cst_9 = arith.constant 0.000000e+00 : f32
    %11 = vector.broadcast %cst_9 : f32 to vector<64x16xf32>
    %12 = arith.cmpf ogt, %10, %11 : vector<64x16xf32>
    %cst_10 = arith.constant 0.00999999977 : f32
    %13 = vector.broadcast %cst_10 : f32 to vector<64x16xf32>
    %14 = arith.mulf %13, %10 : vector<64x16xf32>
    %15 = arith.select %12, %10, %14 : vector<64x16xi1>, vector<64x16xf32>
    %c16 = arith.constant 16 : index
    %c0_11 = arith.constant 0 : index
    %16 = vector.load %arg3[%c16, %c0_11] : memref<256x64xf32, #tpu.memory_space<vmem>>, vector<16x64xf32>
    %cst_12 = arith.constant dense<0.000000e+00> : vector<64x64xf32>
    %17 = tpu.matmul %15, %16, %cst_12 {dimension_numbers = #tpu.dot_dimension_numbers<[1], [0], [0], [1], [0, 0, 1, 1], [], []>} : vector<64x16xf32>, vector<16x64xf32>, vector<64x64xf32> -> vector<64x64xf32>
    %c1 = arith.constant 1 : index
    %c0_13 = arith.constant 0 : index
    %18 = vector.load %arg4[%c1, %c0_13] : memref<16x64xf32, #tpu.memory_space<vmem>>, vector<1x64xf32>
    %19 = vector.broadcast %18 : vector<1x64xf32> to vector<64x64xf32>
    %20 = arith.addf %17, %19 : vector<64x64xf32>
    %c32 = arith.constant 32 : index
    %c0_14 = arith.constant 0 : index
    %21 = vector.load %arg3[%c32, %c0_14] : memref<256x64xf32, #tpu.memory_space<vmem>>, vector<16x64xf32>
    %cst_15 = arith.constant 0.000000e+00 : f32
    %22 = vector.broadcast %cst_15 : f32 to vector<8x16xf32>
    %cst_16 = arith.constant 0.000000e+00 : f32
    %23 = vector.broadcast %cst_16 : f32 to vector<8x16xf32>
    %24 = vector.extract_strided_slice %20 {offsets = [0, 0], sizes = [8, 64], strides = [1, 1]} : vector<64x64xf32> to vector<8x64xf32>
    %cst_17 = arith.constant dense<0.000000e+00> : vector<8x64xf32>
    %25 = tpu.matmul %22, %21, %cst_17 {dimension_numbers = #tpu.dot_dimension_numbers<[1], [0], [0], [1], [0, 0, 1, 1], [], []>} : vector<8x16xf32>, vector<16x64xf32>, vector<8x64xf32> -> vector<8x64xf32>
    %26 = arith.addf %24, %25 : vector<8x64xf32>
    %27 = arith.negf %26 : vector<8x64xf32>
    %28 = math.exp %27 : vector<8x64xf32>
    %cst_18 = arith.constant 1.000000e+00 : f32
    %29 = vector.broadcast %cst_18 : f32 to vector<8x64xf32>
    %30 = arith.addf %29, %28 : vector<8x64xf32>
    %31 = arith.divf %29, %30 : vector<8x64xf32>
    %32 = vector.extract_strided_slice %31 {offsets = [0, 0], sizes = [8, 16], strides = [1, 1]} : vector<8x64xf32> to vector<8x16xf32>
    %33 = vector.extract_strided_slice %31 {offsets = [0, 16], sizes = [8, 16], strides = [1, 1]} : vector<8x64xf32> to vector<8x16xf32>
    %34 = vector.extract_strided_slice %31 {offsets = [0, 48], sizes = [8, 16], strides = [1, 1]} : vector<8x64xf32> to vector<8x16xf32>
    %35 = vector.extract_strided_slice %26 {offsets = [0, 32], sizes = [8, 16], strides = [1, 1]} : vector<8x64xf32> to vector<8x16xf32>
    %36 = math.tanh %35 : vector<8x16xf32>
    %37 = arith.mulf %33, %23 : vector<8x16xf32>
    %38 = arith.mulf %32, %36 : vector<8x16xf32>
    %39 = arith.addf %37, %38 : vector<8x16xf32>
    %40 = math.tanh %39 : vector<8x16xf32>
    %41 = arith.mulf %34, %40 : vector<8x16xf32>
    %42 = vector.extract_strided_slice %20 {offsets = [8, 0], sizes = [8, 64], strides = [1, 1]} : vector<64x64xf32> to vector<8x64xf32>
    %cst_19 = arith.constant dense<0.000000e+00> : vector<8x64xf32>
    %43 = tpu.matmul %41, %21, %cst_19 {dimension_numbers = #tpu.dot_dimension_numbers<[1], [0], [0], [1], [0, 0, 1, 1], [], []>} : vector<8x16xf32>, vector<16x64xf32>, vector<8x64xf32> -> vector<8x64xf32>
    %44 = arith.addf %42, %43 : vector<8x64xf32>
    %45 = arith.negf %44 : vector<8x64xf32>
    %46 = math.exp %45 : vector<8x64xf32>
    %cst_20 = arith.constant 1.000000e+00 : f32
    %47 = vector.broadcast %cst_20 : f32 to vector<8x64xf32>
    %48 = arith.addf %47, %46 : vector<8x64xf32>
    %49 = arith.divf %47, %48 : vector<8x64xf32>
    %50 = vector.extract_strided_slice %49 {offsets = [0, 0], sizes = [8, 16], strides = [1, 1]} : vector<8x64xf32> to vector<8x16xf32>
    %51 = vector.extract_strided_slice %49 {offsets = [0, 16], sizes = [8, 16], strides = [1, 1]} : vector<8x64xf32> to vector<8x16xf32>
    %52 = vector.extract_strided_slice %49 {offsets = [0, 48], sizes = [8, 16], strides = [1, 1]} : vector<8x64xf32> to vector<8x16xf32>
    %53 = vector.extract_strided_slice %44 {offsets = [0, 32], sizes = [8, 16], strides = [1, 1]} : vector<8x64xf32> to vector<8x16xf32>
    %54 = math.tanh %53 : vector<8x16xf32>
    %55 = arith.mulf %51, %39 : vector<8x16xf32>
    %56 = arith.mulf %50, %54 : vector<8x16xf32>
    %57 = arith.addf %55, %56 : vector<8x16xf32>
    %58 = math.tanh %57 : vector<8x16xf32>
    %59 = arith.mulf %52, %58 : vector<8x16xf32>
    %60 = vector.extract_strided_slice %20 {offsets = [16, 0], sizes = [8, 64], strides = [1, 1]} : vector<64x64xf32> to vector<8x64xf32>
    %cst_21 = arith.constant dense<0.000000e+00> : vector<8x64xf32>
    %61 = tpu.matmul %59, %21, %cst_21 {dimension_numbers = #tpu.dot_dimension_numbers<[1], [0], [0], [1], [0, 0, 1, 1], [], []>} : vector<8x16xf32>, vector<16x64xf32>, vector<8x64xf32> -> vector<8x64xf32>
    %62 = arith.addf %60, %61 : vector<8x64xf32>
    %63 = arith.negf %62 : vector<8x64xf32>
    %64 = math.exp %63 : vector<8x64xf32>
    %cst_22 = arith.constant 1.000000e+00 : f32
    %65 = vector.broadcast %cst_22 : f32 to vector<8x64xf32>
    %66 = arith.addf %65, %64 : vector<8x64xf32>
    %67 = arith.divf %65, %66 : vector<8x64xf32>
    %68 = vector.extract_strided_slice %67 {offsets = [0, 0], sizes = [8, 16], strides = [1, 1]} : vector<8x64xf32> to vector<8x16xf32>
    %69 = vector.extract_strided_slice %67 {offsets = [0, 16], sizes = [8, 16], strides = [1, 1]} : vector<8x64xf32> to vector<8x16xf32>
    %70 = vector.extract_strided_slice %67 {offsets = [0, 48], sizes = [8, 16], strides = [1, 1]} : vector<8x64xf32> to vector<8x16xf32>
    %71 = vector.extract_strided_slice %62 {offsets = [0, 32], sizes = [8, 16], strides = [1, 1]} : vector<8x64xf32> to vector<8x16xf32>
    %72 = math.tanh %71 : vector<8x16xf32>
    %73 = arith.mulf %69, %57 : vector<8x16xf32>
    %74 = arith.mulf %68, %72 : vector<8x16xf32>
    %75 = arith.addf %73, %74 : vector<8x16xf32>
    %76 = math.tanh %75 : vector<8x16xf32>
    %77 = arith.mulf %70, %76 : vector<8x16xf32>
    %78 = vector.extract_strided_slice %20 {offsets = [24, 0], sizes = [8, 64], strides = [1, 1]} : vector<64x64xf32> to vector<8x64xf32>
    %cst_23 = arith.constant dense<0.000000e+00> : vector<8x64xf32>
    %79 = tpu.matmul %77, %21, %cst_23 {dimension_numbers = #tpu.dot_dimension_numbers<[1], [0], [0], [1], [0, 0, 1, 1], [], []>} : vector<8x16xf32>, vector<16x64xf32>, vector<8x64xf32> -> vector<8x64xf32>
    %80 = arith.addf %78, %79 : vector<8x64xf32>
    %81 = arith.negf %80 : vector<8x64xf32>
    %82 = math.exp %81 : vector<8x64xf32>
    %cst_24 = arith.constant 1.000000e+00 : f32
    %83 = vector.broadcast %cst_24 : f32 to vector<8x64xf32>
    %84 = arith.addf %83, %82 : vector<8x64xf32>
    %85 = arith.divf %83, %84 : vector<8x64xf32>
    %86 = vector.extract_strided_slice %85 {offsets = [0, 0], sizes = [8, 16], strides = [1, 1]} : vector<8x64xf32> to vector<8x16xf32>
    %87 = vector.extract_strided_slice %85 {offsets = [0, 16], sizes = [8, 16], strides = [1, 1]} : vector<8x64xf32> to vector<8x16xf32>
    %88 = vector.extract_strided_slice %85 {offsets = [0, 48], sizes = [8, 16], strides = [1, 1]} : vector<8x64xf32> to vector<8x16xf32>
    %89 = vector.extract_strided_slice %80 {offsets = [0, 32], sizes = [8, 16], strides = [1, 1]} : vector<8x64xf32> to vector<8x16xf32>
    %90 = math.tanh %89 : vector<8x16xf32>
    %91 = arith.mulf %87, %75 : vector<8x16xf32>
    %92 = arith.mulf %86, %90 : vector<8x16xf32>
    %93 = arith.addf %91, %92 : vector<8x16xf32>
    %94 = math.tanh %93 : vector<8x16xf32>
    %95 = arith.mulf %88, %94 : vector<8x16xf32>
    %96 = vector.extract_strided_slice %20 {offsets = [32, 0], sizes = [8, 64], strides = [1, 1]} : vector<64x64xf32> to vector<8x64xf32>
    %cst_25 = arith.constant dense<0.000000e+00> : vector<8x64xf32>
    %97 = tpu.matmul %95, %21, %cst_25 {dimension_numbers = #tpu.dot_dimension_numbers<[1], [0], [0], [1], [0, 0, 1, 1], [], []>} : vector<8x16xf32>, vector<16x64xf32>, vector<8x64xf32> -> vector<8x64xf32>
    %98 = arith.addf %96, %97 : vector<8x64xf32>
    %99 = arith.negf %98 : vector<8x64xf32>
    %100 = math.exp %99 : vector<8x64xf32>
    %cst_26 = arith.constant 1.000000e+00 : f32
    %101 = vector.broadcast %cst_26 : f32 to vector<8x64xf32>
    %102 = arith.addf %101, %100 : vector<8x64xf32>
    %103 = arith.divf %101, %102 : vector<8x64xf32>
    %104 = vector.extract_strided_slice %103 {offsets = [0, 0], sizes = [8, 16], strides = [1, 1]} : vector<8x64xf32> to vector<8x16xf32>
    %105 = vector.extract_strided_slice %103 {offsets = [0, 16], sizes = [8, 16], strides = [1, 1]} : vector<8x64xf32> to vector<8x16xf32>
    %106 = vector.extract_strided_slice %103 {offsets = [0, 48], sizes = [8, 16], strides = [1, 1]} : vector<8x64xf32> to vector<8x16xf32>
    %107 = vector.extract_strided_slice %98 {offsets = [0, 32], sizes = [8, 16], strides = [1, 1]} : vector<8x64xf32> to vector<8x16xf32>
    %108 = math.tanh %107 : vector<8x16xf32>
    %109 = arith.mulf %105, %93 : vector<8x16xf32>
    %110 = arith.mulf %104, %108 : vector<8x16xf32>
    %111 = arith.addf %109, %110 : vector<8x16xf32>
    %112 = math.tanh %111 : vector<8x16xf32>
    %113 = arith.mulf %106, %112 : vector<8x16xf32>
    %114 = vector.extract_strided_slice %20 {offsets = [40, 0], sizes = [8, 64], strides = [1, 1]} : vector<64x64xf32> to vector<8x64xf32>
    %cst_27 = arith.constant dense<0.000000e+00> : vector<8x64xf32>
    %115 = tpu.matmul %113, %21, %cst_27 {dimension_numbers = #tpu.dot_dimension_numbers<[1], [0], [0], [1], [0, 0, 1, 1], [], []>} : vector<8x16xf32>, vector<16x64xf32>, vector<8x64xf32> -> vector<8x64xf32>
    %116 = arith.addf %114, %115 : vector<8x64xf32>
    %117 = arith.negf %116 : vector<8x64xf32>
    %118 = math.exp %117 : vector<8x64xf32>
    %cst_28 = arith.constant 1.000000e+00 : f32
    %119 = vector.broadcast %cst_28 : f32 to vector<8x64xf32>
    %120 = arith.addf %119, %118 : vector<8x64xf32>
    %121 = arith.divf %119, %120 : vector<8x64xf32>
    %122 = vector.extract_strided_slice %121 {offsets = [0, 0], sizes = [8, 16], strides = [1, 1]} : vector<8x64xf32> to vector<8x16xf32>
    %123 = vector.extract_strided_slice %121 {offsets = [0, 16], sizes = [8, 16], strides = [1, 1]} : vector<8x64xf32> to vector<8x16xf32>
    %124 = vector.extract_strided_slice %121 {offsets = [0, 48], sizes = [8, 16], strides = [1, 1]} : vector<8x64xf32> to vector<8x16xf32>
    %125 = vector.extract_strided_slice %116 {offsets = [0, 32], sizes = [8, 16], strides = [1, 1]} : vector<8x64xf32> to vector<8x16xf32>
    %126 = math.tanh %125 : vector<8x16xf32>
    %127 = arith.mulf %123, %111 : vector<8x16xf32>
    %128 = arith.mulf %122, %126 : vector<8x16xf32>
    %129 = arith.addf %127, %128 : vector<8x16xf32>
    %130 = math.tanh %129 : vector<8x16xf32>
    %131 = arith.mulf %124, %130 : vector<8x16xf32>
    %132 = vector.extract_strided_slice %20 {offsets = [48, 0], sizes = [8, 64], strides = [1, 1]} : vector<64x64xf32> to vector<8x64xf32>
    %cst_29 = arith.constant dense<0.000000e+00> : vector<8x64xf32>
    %133 = tpu.matmul %131, %21, %cst_29 {dimension_numbers = #tpu.dot_dimension_numbers<[1], [0], [0], [1], [0, 0, 1, 1], [], []>} : vector<8x16xf32>, vector<16x64xf32>, vector<8x64xf32> -> vector<8x64xf32>
    %134 = arith.addf %132, %133 : vector<8x64xf32>
    %135 = arith.negf %134 : vector<8x64xf32>
    %136 = math.exp %135 : vector<8x64xf32>
    %cst_30 = arith.constant 1.000000e+00 : f32
    %137 = vector.broadcast %cst_30 : f32 to vector<8x64xf32>
    %138 = arith.addf %137, %136 : vector<8x64xf32>
    %139 = arith.divf %137, %138 : vector<8x64xf32>
    %140 = vector.extract_strided_slice %139 {offsets = [0, 0], sizes = [8, 16], strides = [1, 1]} : vector<8x64xf32> to vector<8x16xf32>
    %141 = vector.extract_strided_slice %139 {offsets = [0, 16], sizes = [8, 16], strides = [1, 1]} : vector<8x64xf32> to vector<8x16xf32>
    %142 = vector.extract_strided_slice %139 {offsets = [0, 48], sizes = [8, 16], strides = [1, 1]} : vector<8x64xf32> to vector<8x16xf32>
    %143 = vector.extract_strided_slice %134 {offsets = [0, 32], sizes = [8, 16], strides = [1, 1]} : vector<8x64xf32> to vector<8x16xf32>
    %144 = math.tanh %143 : vector<8x16xf32>
    %145 = arith.mulf %141, %129 : vector<8x16xf32>
    %146 = arith.mulf %140, %144 : vector<8x16xf32>
    %147 = arith.addf %145, %146 : vector<8x16xf32>
    %148 = math.tanh %147 : vector<8x16xf32>
    %149 = arith.mulf %142, %148 : vector<8x16xf32>
    %150 = vector.extract_strided_slice %20 {offsets = [56, 0], sizes = [8, 64], strides = [1, 1]} : vector<64x64xf32> to vector<8x64xf32>
    %cst_31 = arith.constant dense<0.000000e+00> : vector<8x64xf32>
    %151 = tpu.matmul %149, %21, %cst_31 {dimension_numbers = #tpu.dot_dimension_numbers<[1], [0], [0], [1], [0, 0, 1, 1], [], []>} : vector<8x16xf32>, vector<16x64xf32>, vector<8x64xf32> -> vector<8x64xf32>
    %152 = arith.addf %150, %151 : vector<8x64xf32>
    %153 = arith.negf %152 : vector<8x64xf32>
    %154 = math.exp %153 : vector<8x64xf32>
    %cst_32 = arith.constant 1.000000e+00 : f32
    %155 = vector.broadcast %cst_32 : f32 to vector<8x64xf32>
    %156 = arith.addf %155, %154 : vector<8x64xf32>
    %157 = arith.divf %155, %156 : vector<8x64xf32>
    %158 = vector.extract_strided_slice %157 {offsets = [0, 0], sizes = [8, 16], strides = [1, 1]} : vector<8x64xf32> to vector<8x16xf32>
    %159 = vector.extract_strided_slice %157 {offsets = [0, 16], sizes = [8, 16], strides = [1, 1]} : vector<8x64xf32> to vector<8x16xf32>
    %160 = vector.extract_strided_slice %157 {offsets = [0, 48], sizes = [8, 16], strides = [1, 1]} : vector<8x64xf32> to vector<8x16xf32>
    %161 = vector.extract_strided_slice %152 {offsets = [0, 32], sizes = [8, 16], strides = [1, 1]} : vector<8x64xf32> to vector<8x16xf32>
    %162 = math.tanh %161 : vector<8x16xf32>
    %163 = arith.mulf %159, %147 : vector<8x16xf32>
    %164 = arith.mulf %158, %162 : vector<8x16xf32>
    %165 = arith.addf %163, %164 : vector<8x16xf32>
    %166 = math.tanh %165 : vector<8x16xf32>
    %167 = arith.mulf %160, %166 : vector<8x16xf32>
    %168 = tpu.concatenate %41, %59, %77, %95, %113, %131, %149, %167 in 0 : vector<8x16xf32>, vector<8x16xf32>, vector<8x16xf32>, vector<8x16xf32>, vector<8x16xf32>, vector<8x16xf32>, vector<8x16xf32>, vector<8x16xf32> -> vector<64x16xf32>
    %c48 = arith.constant 48 : index
    %c0_33 = arith.constant 0 : index
    %169 = vector.load %arg3[%c48, %c0_33] : memref<256x64xf32, #tpu.memory_space<vmem>>, vector<16x64xf32>
    %cst_34 = arith.constant dense<0.000000e+00> : vector<64x64xf32>
    %170 = tpu.matmul %168, %169, %cst_34 {dimension_numbers = #tpu.dot_dimension_numbers<[1], [0], [0], [1], [0, 0, 1, 1], [], []>} : vector<64x16xf32>, vector<16x64xf32>, vector<64x64xf32> -> vector<64x64xf32>
    %c2 = arith.constant 2 : index
    %c0_35 = arith.constant 0 : index
    %171 = vector.load %arg4[%c2, %c0_35] : memref<16x64xf32, #tpu.memory_space<vmem>>, vector<1x64xf32>
    %172 = vector.broadcast %171 : vector<1x64xf32> to vector<64x64xf32>
    %173 = arith.addf %170, %172 : vector<64x64xf32>
    %c64 = arith.constant 64 : index
    %c0_36 = arith.constant 0 : index
    %174 = vector.load %arg3[%c64, %c0_36] : memref<256x64xf32, #tpu.memory_space<vmem>>, vector<16x64xf32>
    %cst_37 = arith.constant 0.000000e+00 : f32
    %175 = vector.broadcast %cst_37 : f32 to vector<8x16xf32>
    %cst_38 = arith.constant 0.000000e+00 : f32
    %176 = vector.broadcast %cst_38 : f32 to vector<8x16xf32>
    %177 = vector.extract_strided_slice %173 {offsets = [0, 0], sizes = [8, 64], strides = [1, 1]} : vector<64x64xf32> to vector<8x64xf32>
    %cst_39 = arith.constant dense<0.000000e+00> : vector<8x64xf32>
    %178 = tpu.matmul %175, %174, %cst_39 {dimension_numbers = #tpu.dot_dimension_numbers<[1], [0], [0], [1], [0, 0, 1, 1], [], []>} : vector<8x16xf32>, vector<16x64xf32>, vector<8x64xf32> -> vector<8x64xf32>
    %179 = arith.addf %177, %178 : vector<8x64xf32>
    %180 = arith.negf %179 : vector<8x64xf32>
    %181 = math.exp %180 : vector<8x64xf32>
    %cst_40 = arith.constant 1.000000e+00 : f32
    %182 = vector.broadcast %cst_40 : f32 to vector<8x64xf32>
    %183 = arith.addf %182, %181 : vector<8x64xf32>
    %184 = arith.divf %182, %183 : vector<8x64xf32>
    %185 = vector.extract_strided_slice %184 {offsets = [0, 0], sizes = [8, 16], strides = [1, 1]} : vector<8x64xf32> to vector<8x16xf32>
    %186 = vector.extract_strided_slice %184 {offsets = [0, 16], sizes = [8, 16], strides = [1, 1]} : vector<8x64xf32> to vector<8x16xf32>
    %187 = vector.extract_strided_slice %184 {offsets = [0, 48], sizes = [8, 16], strides = [1, 1]} : vector<8x64xf32> to vector<8x16xf32>
    %188 = vector.extract_strided_slice %179 {offsets = [0, 32], sizes = [8, 16], strides = [1, 1]} : vector<8x64xf32> to vector<8x16xf32>
    %189 = math.tanh %188 : vector<8x16xf32>
    %190 = arith.mulf %186, %176 : vector<8x16xf32>
    %191 = arith.mulf %185, %189 : vector<8x16xf32>
    %192 = arith.addf %190, %191 : vector<8x16xf32>
    %193 = math.tanh %192 : vector<8x16xf32>
    %194 = arith.mulf %187, %193 : vector<8x16xf32>
    %195 = vector.extract_strided_slice %173 {offsets = [8, 0], sizes = [8, 64], strides = [1, 1]} : vector<64x64xf32> to vector<8x64xf32>
    %cst_41 = arith.constant dense<0.000000e+00> : vector<8x64xf32>
    %196 = tpu.matmul %194, %174, %cst_41 {dimension_numbers = #tpu.dot_dimension_numbers<[1], [0], [0], [1], [0, 0, 1, 1], [], []>} : vector<8x16xf32>, vector<16x64xf32>, vector<8x64xf32> -> vector<8x64xf32>
    %197 = arith.addf %195, %196 : vector<8x64xf32>
    %198 = arith.negf %197 : vector<8x64xf32>
    %199 = math.exp %198 : vector<8x64xf32>
    %cst_42 = arith.constant 1.000000e+00 : f32
    %200 = vector.broadcast %cst_42 : f32 to vector<8x64xf32>
    %201 = arith.addf %200, %199 : vector<8x64xf32>
    %202 = arith.divf %200, %201 : vector<8x64xf32>
    %203 = vector.extract_strided_slice %202 {offsets = [0, 0], sizes = [8, 16], strides = [1, 1]} : vector<8x64xf32> to vector<8x16xf32>
    %204 = vector.extract_strided_slice %202 {offsets = [0, 16], sizes = [8, 16], strides = [1, 1]} : vector<8x64xf32> to vector<8x16xf32>
    %205 = vector.extract_strided_slice %202 {offsets = [0, 48], sizes = [8, 16], strides = [1, 1]} : vector<8x64xf32> to vector<8x16xf32>
    %206 = vector.extract_strided_slice %197 {offsets = [0, 32], sizes = [8, 16], strides = [1, 1]} : vector<8x64xf32> to vector<8x16xf32>
    %207 = math.tanh %206 : vector<8x16xf32>
    %208 = arith.mulf %204, %192 : vector<8x16xf32>
    %209 = arith.mulf %203, %207 : vector<8x16xf32>
    %210 = arith.addf %208, %209 : vector<8x16xf32>
    %211 = math.tanh %210 : vector<8x16xf32>
    %212 = arith.mulf %205, %211 : vector<8x16xf32>
    %213 = vector.extract_strided_slice %173 {offsets = [16, 0], sizes = [8, 64], strides = [1, 1]} : vector<64x64xf32> to vector<8x64xf32>
    %cst_43 = arith.constant dense<0.000000e+00> : vector<8x64xf32>
    %214 = tpu.matmul %212, %174, %cst_43 {dimension_numbers = #tpu.dot_dimension_numbers<[1], [0], [0], [1], [0, 0, 1, 1], [], []>} : vector<8x16xf32>, vector<16x64xf32>, vector<8x64xf32> -> vector<8x64xf32>
    %215 = arith.addf %213, %214 : vector<8x64xf32>
    %216 = arith.negf %215 : vector<8x64xf32>
    %217 = math.exp %216 : vector<8x64xf32>
    %cst_44 = arith.constant 1.000000e+00 : f32
    %218 = vector.broadcast %cst_44 : f32 to vector<8x64xf32>
    %219 = arith.addf %218, %217 : vector<8x64xf32>
    %220 = arith.divf %218, %219 : vector<8x64xf32>
    %221 = vector.extract_strided_slice %220 {offsets = [0, 0], sizes = [8, 16], strides = [1, 1]} : vector<8x64xf32> to vector<8x16xf32>
    %222 = vector.extract_strided_slice %220 {offsets = [0, 16], sizes = [8, 16], strides = [1, 1]} : vector<8x64xf32> to vector<8x16xf32>
    %223 = vector.extract_strided_slice %220 {offsets = [0, 48], sizes = [8, 16], strides = [1, 1]} : vector<8x64xf32> to vector<8x16xf32>
    %224 = vector.extract_strided_slice %215 {offsets = [0, 32], sizes = [8, 16], strides = [1, 1]} : vector<8x64xf32> to vector<8x16xf32>
    %225 = math.tanh %224 : vector<8x16xf32>
    %226 = arith.mulf %222, %210 : vector<8x16xf32>
    %227 = arith.mulf %221, %225 : vector<8x16xf32>
    %228 = arith.addf %226, %227 : vector<8x16xf32>
    %229 = math.tanh %228 : vector<8x16xf32>
    %230 = arith.mulf %223, %229 : vector<8x16xf32>
    %231 = vector.extract_strided_slice %173 {offsets = [24, 0], sizes = [8, 64], strides = [1, 1]} : vector<64x64xf32> to vector<8x64xf32>
    %cst_45 = arith.constant dense<0.000000e+00> : vector<8x64xf32>
    %232 = tpu.matmul %230, %174, %cst_45 {dimension_numbers = #tpu.dot_dimension_numbers<[1], [0], [0], [1], [0, 0, 1, 1], [], []>} : vector<8x16xf32>, vector<16x64xf32>, vector<8x64xf32> -> vector<8x64xf32>
    %233 = arith.addf %231, %232 : vector<8x64xf32>
    %234 = arith.negf %233 : vector<8x64xf32>
    %235 = math.exp %234 : vector<8x64xf32>
    %cst_46 = arith.constant 1.000000e+00 : f32
    %236 = vector.broadcast %cst_46 : f32 to vector<8x64xf32>
    %237 = arith.addf %236, %235 : vector<8x64xf32>
    %238 = arith.divf %236, %237 : vector<8x64xf32>
    %239 = vector.extract_strided_slice %238 {offsets = [0, 0], sizes = [8, 16], strides = [1, 1]} : vector<8x64xf32> to vector<8x16xf32>
    %240 = vector.extract_strided_slice %238 {offsets = [0, 16], sizes = [8, 16], strides = [1, 1]} : vector<8x64xf32> to vector<8x16xf32>
    %241 = vector.extract_strided_slice %238 {offsets = [0, 48], sizes = [8, 16], strides = [1, 1]} : vector<8x64xf32> to vector<8x16xf32>
    %242 = vector.extract_strided_slice %233 {offsets = [0, 32], sizes = [8, 16], strides = [1, 1]} : vector<8x64xf32> to vector<8x16xf32>
    %243 = math.tanh %242 : vector<8x16xf32>
    %244 = arith.mulf %240, %228 : vector<8x16xf32>
    %245 = arith.mulf %239, %243 : vector<8x16xf32>
    %246 = arith.addf %244, %245 : vector<8x16xf32>
    %247 = math.tanh %246 : vector<8x16xf32>
    %248 = arith.mulf %241, %247 : vector<8x16xf32>
    %249 = vector.extract_strided_slice %173 {offsets = [32, 0], sizes = [8, 64], strides = [1, 1]} : vector<64x64xf32> to vector<8x64xf32>
    %cst_47 = arith.constant dense<0.000000e+00> : vector<8x64xf32>
    %250 = tpu.matmul %248, %174, %cst_47 {dimension_numbers = #tpu.dot_dimension_numbers<[1], [0], [0], [1], [0, 0, 1, 1], [], []>} : vector<8x16xf32>, vector<16x64xf32>, vector<8x64xf32> -> vector<8x64xf32>
    %251 = arith.addf %249, %250 : vector<8x64xf32>
    %252 = arith.negf %251 : vector<8x64xf32>
    %253 = math.exp %252 : vector<8x64xf32>
    %cst_48 = arith.constant 1.000000e+00 : f32
    %254 = vector.broadcast %cst_48 : f32 to vector<8x64xf32>
    %255 = arith.addf %254, %253 : vector<8x64xf32>
    %256 = arith.divf %254, %255 : vector<8x64xf32>
    %257 = vector.extract_strided_slice %256 {offsets = [0, 0], sizes = [8, 16], strides = [1, 1]} : vector<8x64xf32> to vector<8x16xf32>
    %258 = vector.extract_strided_slice %256 {offsets = [0, 16], sizes = [8, 16], strides = [1, 1]} : vector<8x64xf32> to vector<8x16xf32>
    %259 = vector.extract_strided_slice %256 {offsets = [0, 48], sizes = [8, 16], strides = [1, 1]} : vector<8x64xf32> to vector<8x16xf32>
    %260 = vector.extract_strided_slice %251 {offsets = [0, 32], sizes = [8, 16], strides = [1, 1]} : vector<8x64xf32> to vector<8x16xf32>
    %261 = math.tanh %260 : vector<8x16xf32>
    %262 = arith.mulf %258, %246 : vector<8x16xf32>
    %263 = arith.mulf %257, %261 : vector<8x16xf32>
    %264 = arith.addf %262, %263 : vector<8x16xf32>
    %265 = math.tanh %264 : vector<8x16xf32>
    %266 = arith.mulf %259, %265 : vector<8x16xf32>
    %267 = vector.extract_strided_slice %173 {offsets = [40, 0], sizes = [8, 64], strides = [1, 1]} : vector<64x64xf32> to vector<8x64xf32>
    %cst_49 = arith.constant dense<0.000000e+00> : vector<8x64xf32>
    %268 = tpu.matmul %266, %174, %cst_49 {dimension_numbers = #tpu.dot_dimension_numbers<[1], [0], [0], [1], [0, 0, 1, 1], [], []>} : vector<8x16xf32>, vector<16x64xf32>, vector<8x64xf32> -> vector<8x64xf32>
    %269 = arith.addf %267, %268 : vector<8x64xf32>
    %270 = arith.negf %269 : vector<8x64xf32>
    %271 = math.exp %270 : vector<8x64xf32>
    %cst_50 = arith.constant 1.000000e+00 : f32
    %272 = vector.broadcast %cst_50 : f32 to vector<8x64xf32>
    %273 = arith.addf %272, %271 : vector<8x64xf32>
    %274 = arith.divf %272, %273 : vector<8x64xf32>
    %275 = vector.extract_strided_slice %274 {offsets = [0, 0], sizes = [8, 16], strides = [1, 1]} : vector<8x64xf32> to vector<8x16xf32>
    %276 = vector.extract_strided_slice %274 {offsets = [0, 16], sizes = [8, 16], strides = [1, 1]} : vector<8x64xf32> to vector<8x16xf32>
    %277 = vector.extract_strided_slice %274 {offsets = [0, 48], sizes = [8, 16], strides = [1, 1]} : vector<8x64xf32> to vector<8x16xf32>
    %278 = vector.extract_strided_slice %269 {offsets = [0, 32], sizes = [8, 16], strides = [1, 1]} : vector<8x64xf32> to vector<8x16xf32>
    %279 = math.tanh %278 : vector<8x16xf32>
    %280 = arith.mulf %276, %264 : vector<8x16xf32>
    %281 = arith.mulf %275, %279 : vector<8x16xf32>
    %282 = arith.addf %280, %281 : vector<8x16xf32>
    %283 = math.tanh %282 : vector<8x16xf32>
    %284 = arith.mulf %277, %283 : vector<8x16xf32>
    %285 = vector.extract_strided_slice %173 {offsets = [48, 0], sizes = [8, 64], strides = [1, 1]} : vector<64x64xf32> to vector<8x64xf32>
    %cst_51 = arith.constant dense<0.000000e+00> : vector<8x64xf32>
    %286 = tpu.matmul %284, %174, %cst_51 {dimension_numbers = #tpu.dot_dimension_numbers<[1], [0], [0], [1], [0, 0, 1, 1], [], []>} : vector<8x16xf32>, vector<16x64xf32>, vector<8x64xf32> -> vector<8x64xf32>
    %287 = arith.addf %285, %286 : vector<8x64xf32>
    %288 = arith.negf %287 : vector<8x64xf32>
    %289 = math.exp %288 : vector<8x64xf32>
    %cst_52 = arith.constant 1.000000e+00 : f32
    %290 = vector.broadcast %cst_52 : f32 to vector<8x64xf32>
    %291 = arith.addf %290, %289 : vector<8x64xf32>
    %292 = arith.divf %290, %291 : vector<8x64xf32>
    %293 = vector.extract_strided_slice %292 {offsets = [0, 0], sizes = [8, 16], strides = [1, 1]} : vector<8x64xf32> to vector<8x16xf32>
    %294 = vector.extract_strided_slice %292 {offsets = [0, 16], sizes = [8, 16], strides = [1, 1]} : vector<8x64xf32> to vector<8x16xf32>
    %295 = vector.extract_strided_slice %292 {offsets = [0, 48], sizes = [8, 16], strides = [1, 1]} : vector<8x64xf32> to vector<8x16xf32>
    %296 = vector.extract_strided_slice %287 {offsets = [0, 32], sizes = [8, 16], strides = [1, 1]} : vector<8x64xf32> to vector<8x16xf32>
    %297 = math.tanh %296 : vector<8x16xf32>
    %298 = arith.mulf %294, %282 : vector<8x16xf32>
    %299 = arith.mulf %293, %297 : vector<8x16xf32>
    %300 = arith.addf %298, %299 : vector<8x16xf32>
    %301 = math.tanh %300 : vector<8x16xf32>
    %302 = arith.mulf %295, %301 : vector<8x16xf32>
    %303 = vector.extract_strided_slice %173 {offsets = [56, 0], sizes = [8, 64], strides = [1, 1]} : vector<64x64xf32> to vector<8x64xf32>
    %cst_53 = arith.constant dense<0.000000e+00> : vector<8x64xf32>
    %304 = tpu.matmul %302, %174, %cst_53 {dimension_numbers = #tpu.dot_dimension_numbers<[1], [0], [0], [1], [0, 0, 1, 1], [], []>} : vector<8x16xf32>, vector<16x64xf32>, vector<8x64xf32> -> vector<8x64xf32>
    %305 = arith.addf %303, %304 : vector<8x64xf32>
    %306 = arith.negf %305 : vector<8x64xf32>
    %307 = math.exp %306 : vector<8x64xf32>
    %cst_54 = arith.constant 1.000000e+00 : f32
    %308 = vector.broadcast %cst_54 : f32 to vector<8x64xf32>
    %309 = arith.addf %308, %307 : vector<8x64xf32>
    %310 = arith.divf %308, %309 : vector<8x64xf32>
    %311 = vector.extract_strided_slice %310 {offsets = [0, 0], sizes = [8, 16], strides = [1, 1]} : vector<8x64xf32> to vector<8x16xf32>
    %312 = vector.extract_strided_slice %310 {offsets = [0, 16], sizes = [8, 16], strides = [1, 1]} : vector<8x64xf32> to vector<8x16xf32>
    %313 = vector.extract_strided_slice %310 {offsets = [0, 48], sizes = [8, 16], strides = [1, 1]} : vector<8x64xf32> to vector<8x16xf32>
    %314 = vector.extract_strided_slice %305 {offsets = [0, 32], sizes = [8, 16], strides = [1, 1]} : vector<8x64xf32> to vector<8x16xf32>
    %315 = math.tanh %314 : vector<8x16xf32>
    %316 = arith.mulf %312, %300 : vector<8x16xf32>
    %317 = arith.mulf %311, %315 : vector<8x16xf32>
    %318 = arith.addf %316, %317 : vector<8x16xf32>
    %319 = math.tanh %318 : vector<8x16xf32>
    %320 = arith.mulf %313, %319 : vector<8x16xf32>
    %321 = tpu.concatenate %194, %212, %230, %248, %266, %284, %302, %320 in 0 : vector<8x16xf32>, vector<8x16xf32>, vector<8x16xf32>, vector<8x16xf32>, vector<8x16xf32>, vector<8x16xf32>, vector<8x16xf32>, vector<8x16xf32> -> vector<64x16xf32>
    %322 = tpu.concatenate %321, %3 in 1 : vector<64x16xf32>, vector<64x8xf32> -> vector<64x24xf32>
    %c80 = arith.constant 80 : index
    %c0_55 = arith.constant 0 : index
    %323 = vector.load %arg3[%c80, %c0_55] : memref<256x64xf32, #tpu.memory_space<vmem>>, vector<24x13xf32>
    %cst_56 = arith.constant dense<0.000000e+00> : vector<64x13xf32>
    %324 = tpu.matmul %322, %323, %cst_56 {dimension_numbers = #tpu.dot_dimension_numbers<[1], [0], [0], [1], [0, 0, 1, 1], [], []>} : vector<64x24xf32>, vector<24x13xf32>, vector<64x13xf32> -> vector<64x13xf32>
    %c3 = arith.constant 3 : index
    %c0_57 = arith.constant 0 : index
    %325 = vector.load %arg4[%c3, %c0_57] : memref<16x64xf32, #tpu.memory_space<vmem>>, vector<1x13xf32>
    %326 = vector.broadcast %325 : vector<1x13xf32> to vector<64x13xf32>
    %327 = arith.addf %324, %326 : vector<64x13xf32>
    %cst_58 = arith.constant 0.000000e+00 : f32
    %328 = vector.broadcast %cst_58 : f32 to vector<64x13xf32>
    %329 = arith.cmpf ogt, %327, %328 : vector<64x13xf32>
    %cst_59 = arith.constant 0.00999999977 : f32
    %330 = vector.broadcast %cst_59 : f32 to vector<64x13xf32>
    %331 = arith.mulf %330, %327 : vector<64x13xf32>
    %332 = arith.select %329, %327, %331 : vector<64x13xi1>, vector<64x13xf32>
    %c104 = arith.constant 104 : index
    %c0_60 = arith.constant 0 : index
    %333 = vector.load %arg3[%c104, %c0_60] : memref<256x64xf32, #tpu.memory_space<vmem>>, vector<13x13xf32>
    %cst_61 = arith.constant dense<0.000000e+00> : vector<64x13xf32>
    %334 = tpu.matmul %332, %333, %cst_61 {dimension_numbers = #tpu.dot_dimension_numbers<[1], [0], [0], [1], [0, 0, 1, 1], [], []>} : vector<64x13xf32>, vector<13x13xf32>, vector<64x13xf32> -> vector<64x13xf32>
    %c4 = arith.constant 4 : index
    %c0_62 = arith.constant 0 : index
    %335 = vector.load %arg4[%c4, %c0_62] : memref<16x64xf32, #tpu.memory_space<vmem>>, vector<1x13xf32>
    %336 = vector.broadcast %335 : vector<1x13xf32> to vector<64x13xf32>
    %337 = arith.addf %334, %336 : vector<64x13xf32>
    %cst_63 = arith.constant 0.000000e+00 : f32
    %338 = vector.broadcast %cst_63 : f32 to vector<64x13xf32>
    %339 = arith.cmpf ogt, %337, %338 : vector<64x13xf32>
    %cst_64 = arith.constant 0.00999999977 : f32
    %340 = vector.broadcast %cst_64 : f32 to vector<64x13xf32>
    %341 = arith.mulf %340, %337 : vector<64x13xf32>
    %342 = arith.select %339, %337, %341 : vector<64x13xi1>, vector<64x13xf32>
    %c120 = arith.constant 120 : index
    %c0_65 = arith.constant 0 : index
    %343 = vector.load %arg3[%c120, %c0_65] : memref<256x64xf32, #tpu.memory_space<vmem>>, vector<13x16xf32>
    %cst_66 = arith.constant dense<0.000000e+00> : vector<64x16xf32>
    %344 = tpu.matmul %342, %343, %cst_66 {dimension_numbers = #tpu.dot_dimension_numbers<[1], [0], [0], [1], [0, 0, 1, 1], [], []>} : vector<64x13xf32>, vector<13x16xf32>, vector<64x16xf32> -> vector<64x16xf32>
    %c5 = arith.constant 5 : index
    %c0_67 = arith.constant 0 : index
    %345 = vector.load %arg4[%c5, %c0_67] : memref<16x64xf32, #tpu.memory_space<vmem>>, vector<1x16xf32>
    %346 = vector.broadcast %345 : vector<1x16xf32> to vector<64x16xf32>
    %347 = arith.addf %344, %346 : vector<64x16xf32>
    %348 = vector.extract_strided_slice %347 {offsets = [0, 0], sizes = [64, 8], strides = [1, 1]} : vector<64x16xf32> to vector<64x8xf32>
    %349 = vector.extract_strided_slice %347 {offsets = [0, 8], sizes = [64, 8], strides = [1, 1]} : vector<64x16xf32> to vector<64x8xf32>
    %cst_68 = arith.constant 5.000000e-01 : f32
    %350 = vector.broadcast %cst_68 : f32 to vector<64x8xf32>
    %351 = arith.mulf %350, %349 : vector<64x8xf32>
    %352 = math.exp %351 : vector<64x8xf32>
    %353 = arith.mulf %352, %5 : vector<64x8xf32>
    %354 = arith.addf %348, %353 : vector<64x8xf32>
    %355 = tpu.concatenate %321, %354 in 1 : vector<64x16xf32>, vector<64x8xf32> -> vector<64x24xf32>
    %c136 = arith.constant 136 : index
    %c0_69 = arith.constant 0 : index
    %356 = vector.load %arg3[%c136, %c0_69] : memref<256x64xf32, #tpu.memory_space<vmem>>, vector<24x48xf32>
    %cst_70 = arith.constant dense<0.000000e+00> : vector<64x48xf32>
    %357 = tpu.matmul %355, %356, %cst_70 {dimension_numbers = #tpu.dot_dimension_numbers<[1], [0], [0], [1], [0, 0, 1, 1], [], []>} : vector<64x24xf32>, vector<24x48xf32>, vector<64x48xf32> -> vector<64x48xf32>
    %c6 = arith.constant 6 : index
    %c0_71 = arith.constant 0 : index
    %358 = vector.load %arg4[%c6, %c0_71] : memref<16x64xf32, #tpu.memory_space<vmem>>, vector<1x48xf32>
    %359 = vector.broadcast %358 : vector<1x48xf32> to vector<64x48xf32>
    %360 = arith.addf %357, %359 : vector<64x48xf32>
    %cst_72 = arith.constant 0.000000e+00 : f32
    %361 = vector.broadcast %cst_72 : f32 to vector<64x48xf32>
    %362 = arith.cmpf ogt, %360, %361 : vector<64x48xf32>
    %cst_73 = arith.constant 0.00999999977 : f32
    %363 = vector.broadcast %cst_73 : f32 to vector<64x48xf32>
    %364 = arith.mulf %363, %360 : vector<64x48xf32>
    %365 = arith.select %362, %360, %364 : vector<64x48xi1>, vector<64x48xf32>
    %c160 = arith.constant 160 : index
    %c0_74 = arith.constant 0 : index
    %366 = vector.load %arg3[%c160, %c0_74] : memref<256x64xf32, #tpu.memory_space<vmem>>, vector<48x48xf32>
    %cst_75 = arith.constant dense<0.000000e+00> : vector<64x48xf32>
    %367 = tpu.matmul %365, %366, %cst_75 {dimension_numbers = #tpu.dot_dimension_numbers<[1], [0], [0], [1], [0, 0, 1, 1], [], []>} : vector<64x48xf32>, vector<48x48xf32>, vector<64x48xf32> -> vector<64x48xf32>
    %c7 = arith.constant 7 : index
    %c0_76 = arith.constant 0 : index
    %368 = vector.load %arg4[%c7, %c0_76] : memref<16x64xf32, #tpu.memory_space<vmem>>, vector<1x48xf32>
    %369 = vector.broadcast %368 : vector<1x48xf32> to vector<64x48xf32>
    %370 = arith.addf %367, %369 : vector<64x48xf32>
    %cst_77 = arith.constant 0.000000e+00 : f32
    %371 = vector.broadcast %cst_77 : f32 to vector<64x48xf32>
    %372 = arith.cmpf ogt, %370, %371 : vector<64x48xf32>
    %cst_78 = arith.constant 0.00999999977 : f32
    %373 = vector.broadcast %cst_78 : f32 to vector<64x48xf32>
    %374 = arith.mulf %373, %370 : vector<64x48xf32>
    %375 = arith.select %372, %370, %374 : vector<64x48xi1>, vector<64x48xf32>
    %c208 = arith.constant 208 : index
    %c0_79 = arith.constant 0 : index
    %376 = vector.load %arg3[%c208, %c0_79] : memref<256x64xf32, #tpu.memory_space<vmem>>, vector<48x24xf32>
    %cst_80 = arith.constant dense<0.000000e+00> : vector<64x24xf32>
    %377 = tpu.matmul %375, %376, %cst_80 {dimension_numbers = #tpu.dot_dimension_numbers<[1], [0], [0], [1], [0, 0, 1, 1], [], []>} : vector<64x48xf32>, vector<48x24xf32>, vector<64x24xf32> -> vector<64x24xf32>
    %c8 = arith.constant 8 : index
    %c0_81 = arith.constant 0 : index
    %378 = vector.load %arg4[%c8, %c0_81] : memref<16x64xf32, #tpu.memory_space<vmem>>, vector<1x24xf32>
    %379 = vector.broadcast %378 : vector<1x24xf32> to vector<64x24xf32>
    %380 = arith.addf %377, %379 : vector<64x24xf32>
    %381 = arith.negf %380 : vector<64x24xf32>
    %382 = math.exp %381 : vector<64x24xf32>
    %cst_82 = arith.constant 1.000000e+00 : f32
    %383 = vector.broadcast %cst_82 : f32 to vector<64x24xf32>
    %384 = arith.addf %383, %382 : vector<64x24xf32>
    %385 = arith.divf %383, %384 : vector<64x24xf32>
    %cst_83 = arith.constant 0.000000e+00 : f32
    %386 = vector.broadcast %cst_83 : f32 to vector<64x80xf32>
    %387 = tpu.concatenate %385, %348, %349, %354, %386 in 1 : vector<64x24xf32>, vector<64x8xf32>, vector<64x8xf32>, vector<64x8xf32>, vector<64x80xf32> -> vector<64x128xf32>
    %388 = vector.shape_cast %387 : vector<64x128xf32> to vector<8x8x128xf32>
    %c0_84 = arith.constant 0 : index
    %c0_85 = arith.constant 0 : index
    %c0_86 = arith.constant 0 : index
    %389 = vector.load %arg5[%c0_84, %c0_85, %c0_86] : memref<8x8x128xf32, #tpu.memory_space<vmem>>, vector<8x8x128xf32>
    tpu.vector_store %arg5[%c0_84, %c0_85, %c0_86], %388 {strides = array<i32>} : memref<8x8x128xf32, #tpu.memory_space<vmem>>, vector<8x8x128xf32>,
    return
  }
  func.func @transform_0(%arg0: i32) -> (i32, i32, i32) {
    %c0_i32 = arith.constant 0 : i32
    %c0_i32_0 = arith.constant 0 : i32
    %c0_i32_1 = arith.constant 0 : i32
    return %c0_i32, %arg0, %c0_i32_0 : i32, i32, i32
  }
  func.func @transform_1(%arg0: i32) -> (i32, i32, i32) {
    %c0_i32 = arith.constant 0 : i32
    %c0_i32_0 = arith.constant 0 : i32
    %c0_i32_1 = arith.constant 0 : i32
    return %c0_i32, %arg0, %c0_i32_0 : i32, i32, i32
  }
  func.func @transform_2(%arg0: i32) -> (i32, i32) {
    %c0_i32 = arith.constant 0 : i32
    %c0_i32_0 = arith.constant 0 : i32
    %c0_i32_1 = arith.constant 0 : i32
    return %c0_i32, %c0_i32_0 : i32, i32
  }
  func.func @transform_3(%arg0: i32) -> (i32, i32) {
    %c0_i32 = arith.constant 0 : i32
    %c0_i32_0 = arith.constant 0 : i32
    %c0_i32_1 = arith.constant 0 : i32
    return %c0_i32, %c0_i32_0 : i32, i32
  }
  func.func @transform_4(%arg0: i32) -> (i32, i32, i32) {
    %c0_i32 = arith.constant 0 : i32
    %c0_i32_0 = arith.constant 0 : i32
    %c0_i32_1 = arith.constant 0 : i32
    return %c0_i32, %arg0, %c0_i32_0 : i32, i32, i32
  }
}

</mosaic_0001>

<bundles_post_ra>
// kernel: tpu_custom_call.1
= control target key start
LH: loop header
LB: loop body
LE: loop exit
PB: predicated region body
PF: predicated region fallthrough
CT: control target
= control target key end

     0   :  { %9 = vsyncpa [#allocation5], 0  ;;  %s5414_s0 = inlined_call_operand.vmem [shape: f32[8,16,24], index: 0, kind: input, shape index: {}]   ;;  %s5415_s1 = inlined_call_operand.vmem [shape: f32[8,16,8], index: 1, kind: input, shape index: {}]   ;;  %s5416_s2 = inlined_call_operand.vmem [shape: f32[256,64], index: 2, kind: input, shape index: {}]   ;;  %s5417_s3 = inlined_call_operand.vmem [shape: f32[16,64], index: 3, kind: input, shape index: {}]   ;;  %s5418_s4 = inlined_call_operand.hbm [shape: f32[8,16,128], index: 4, kind: output, shape index: {}]  }
   0x1   :  { %11 = vsyncpa [#allocation5 + $0x1], 0  ;;  %s4604_s15 = smov 0   ;;  %s4606_s16 = smov 0  }
   0x2   :  { %s4608_s17 = smov 0   ;;  %s4610_s18 = smov 0  }
   0x3 LB: > { %s3708_s19 = sadd.s32 4294967295, %s4564_s18   ;;  %s3709_s20 = sadd.s32 4294967294, %s4564_s18   ;;  %s4564_s18 = sphi %s4610_s18, %s5425_s18   ;;  %s4560_s17 = sphi %s4608_s17, %s5424_s17   ;;  %s4556_s16 = sphi %s4606_s16, %s5423_s16   ;;  %s4552_s15 = sphi %s4604_s15, %s5422_s15  }
   0x4   : > { %s4627_s21 = sadd.s32 1, %s4564_s18   ;;  %s24_s22 = sadd.s32 1, %s4560_s17 }
   0x5   : > { %s21_s23 = ssub.s32 %s4564_s18, %s4627_s21  ;;  %p31_p0 = scmp.ne.s32.totalorder %s4560_s17, %s4556_s16 }
   0x6   : > { %p22_p1 = scmp.eq.s32.totalorder %s21_s23, 0  ;;  %p32_p2 = scmp.eq.s32.totalorder %s4564_s18, 0 }
   0x7   : > { %p129_p3 = scmp.eq.s32.totalorder %s3708_s19, 1  ;;  %p134_p4 = scmp.ne.s32.totalorder %s4556_s16, %s4552_s15 }
   0x8   : > { %s4640_s24 = scalar_select %p22_p1, %s4560_s17, %s24_s22  }
   0x9   : > { %p4642_p5 = por %p32_p2, %p31_p0  ;;  %p4646_p6 = por %p129_p3, %p31_p0 }
   0xa   : > { %p135_p7 = scmp.eq.s32.totalorder %s3709_s20, 1  ;;  %p3711_p9 = scmp.ge.s32.totalorder %s4564_s18, 2 }
   0xc   : > { %p4650_p8 = por %p135_p7, %p134_p4  ;;  %157 = sbr.rel (%p3711_p9) target bundleno = 33 (0x21), region = 24 }
  0x11   : > { %160 = sbr.rel (!%p4642_p5) target bundleno = 25 (0x19), region = 28  ;;  %s162_s28 = sand.u32 (%p4642_p5), 1, %s4560_s17  }
  0x12   : > { %s3713_s29 = sshll.u32 (%p4642_p5), %s4564_s18, 3  ;;  %s3712_s30 = sshll.u32 (%p4642_p5), %s162_s28, 6 }
  0x13   : > { %s166_s7 = scalar_lea.vmem (%p4642_p5), %s5414_s0, %s3713_s29  ;;  %s164_s8 = scalar_lea.vmem (%p4642_p5), [#allocation2], %s3712_s30 }
  0x14   : > { %v209_v0 = vld [vmem:[%s166_s7] sm:$0xff] (%p4642_p5)  ;;  %v211_v1 = vld [vmem:[%s166_s7 + $0x10] sm:$0xff] (%p4642_p5) }
  0x15   : > { %v213_v2 = vld [vmem:[%s166_s7 + $0x20] sm:$0xff] (%p4642_p5)  ;;  %210 = vst [vmem:[%s164_s8] sm:$0xff] (%p4642_p5), %v209_v0  ;;  %212 = vst [vmem:[%s164_s8 + $0x8] sm:$0xff] (%p4642_p5), %v211_v1  ;;  %v215_v3 = vld [vmem:[%s166_s7 + $0x30] sm:$0xff] (%p4642_p5) }
  0x16   : > { %214 = vst [vmem:[%s164_s8 + $0x10] sm:$0xff] %v213_v2  ;;  %v217_v4 = vld [vmem:[%s166_s7 + $0x40] sm:$0xff]  ;;  %v219_v5 = vld [vmem:[%s166_s7 + $0x50] sm:$0xff]  ;;  %216 = vst [vmem:[%s164_s8 + $0x18] sm:$0xff] %v215_v3 }
  0x17   : > { %218 = vst [vmem:[%s164_s8 + $0x20] sm:$0xff] %v217_v4  ;;  %220 = vst [vmem:[%s164_s8 + $0x28] sm:$0xff] %v219_v5  ;;  %v221_v6 = vld [vmem:[%s166_s7 + $0x60] sm:$0xff]  ;;  %v223_v7 = vld [vmem:[%s166_s7 + $0x70] sm:$0xff] }
  0x18   : > { %222 = vst [vmem:[%s164_s8 + $0x30] sm:$0xff] %v221_v6  ;;  %224 = vst [vmem:[%s164_s8 + $0x38] sm:$0xff] %v223_v7 }
  0x19 PF: > { %230 = sbr.rel (!%p4642_p5) target bundleno = 33 (0x21), region = 66  ;;  %s232_s9 = sand.u32 (%p4642_p5), 1, %s4560_s17  }
  0x1a   : > { %s3715_s10 = sshll.u32 (%p4642_p5), %s4564_s18, 3  ;;  %s3714_s11 = sshll.u32 (%p4642_p5), %s232_s9, 6 }
  0x1b   : > { %s236_s14 = scalar_lea.vmem (%p4642_p5), %s5415_s1, %s3715_s10  ;;  %s234_s20 = scalar_lea.vmem (%p4642_p5), [#allocation3], %s3714_s11 }
  0x1c   : > { %v279_v8 = vld [vmem:[%s236_s14] sm:$0xff] (%p4642_p5)  ;;  %v281_v9 = vld [vmem:[%s236_s14 + $0x10] sm:$0xff] (%p4642_p5) }
  0x1d   : > { %v283_v10 = vld [vmem:[%s236_s14 + $0x20] sm:$0xff] (%p4642_p5)  ;;  %280 = vst [vmem:[%s234_s20] sm:$0xff] (%p4642_p5), %v279_v8  ;;  %282 = vst [vmem:[%s234_s20 + $0x8] sm:$0xff] (%p4642_p5), %v281_v9  ;;  %v285_v11 = vld [vmem:[%s236_s14 + $0x30] sm:$0xff] (%p4642_p5) }
  0x1e   : > { %284 = vst [vmem:[%s234_s20 + $0x10] sm:$0xff] %v283_v10  ;;  %v287_v12 = vld [vmem:[%s236_s14 + $0x40] sm:$0xff]  ;;  %v289_v13 = vld [vmem:[%s236_s14 + $0x50] sm:$0xff]  ;;  %286 = vst [vmem:[%s234_s20 + $0x18] sm:$0xff] %v285_v11 }
  0x1f   : > { %288 = vst [vmem:[%s234_s20 + $0x20] sm:$0xff] %v287_v12  ;;  %290 = vst [vmem:[%s234_s20 + $0x28] sm:$0xff] %v289_v13  ;;  %v291_v14 = vld [vmem:[%s236_s14 + $0x60] sm:$0xff]  ;;  %v293_v15 = vld [vmem:[%s236_s14 + $0x70] sm:$0xff] }
  0x20   : > { %292 = vst [vmem:[%s234_s20 + $0x30] sm:$0xff] %v291_v14  ;;  %294 = vst [vmem:[%s234_s20 + $0x38] sm:$0xff] %v293_v15 }
  0x21 PF: > { %p3716_p10 = scmp.ge.s32.totalorder %s4564_s18, 1  ;;  %p299_p11 = scmp.lt.s32.totalorder %s4564_s18, 3 }
  0x23   : > { %p300_p12 = pnand %p3716_p10, %p299_p11 }
  0x24   : > { %s306_s29 = sand.u32 (!%p300_p12), 1, %s4556_s16   ;;  %s4568_s25 = smov (!%p300_p12), 96  }
  0x25   : > { %303 = sbr.rel (%p300_p12) target bundleno = 12094 (0x2f3e), region = 104  ;;  %s4682_s30 = sshll.u32 (!%p300_p12), %s306_s29, 6 }
  0x26   : > { %s4690_s7 = scalar_lea.vmem (!%p300_p12), [#allocation2], %s4682_s30  ;;  %s4569_s28 = smov (!%p300_p12), 16  }
  0x27   : > { %s4570_s5 = smov (!%p300_p12), 32   ;;  %s4571_s6 = smov (!%p300_p12), 80  }
  0x28   : > { %s4573_s22 = smov (!%p300_p12), 120   ;;  %s5318_s13 = scalar_lea.vmem (!%p300_p12), [#allocation4], %s4682_s30 }
  0x29   : > { %s3842_s14 = sshll.u32 (!%p300_p12), %s3708_s19, 7  ;;  %s5372_s23 = scalar_lea.sflag (!%p300_p12), [#allocation5], %s306_s29 }
  0x2a   : > { %v359_v16 = vld [vmem:[%s5416_s2 + $0x8] sm:$0xff]  ;;  %v358_v17 = vld [vmem:[%s5416_s2] sm:$0xff]  ;;  %vm365_vm0 = vcmask 130048   ;;  %v344_v21 = vld [vmem:[%s4690_s7 + $0x10] sm:$0xff]  ;;  %v4566_v22 = vmov 0.0   ;;  %vm4567_vm1 = vmmov 0  }
  0x2b   : > { %3993 = vmatprep.subr.mxu0 %v359_v16  ;;  %v4687_v18 = vld [vmem:[%s5416_s2 + $0x28] sm:$0xff]  ;;  %v342_v19 = vld [vmem:[%s4690_s7] sm:$0xff]  ;;  %v345_v23 = vld [vmem:[%s4690_s7 + $0x18] sm:$0xff]  ;;  %vm2396_vm10 = vcmask 195584   ;;  %vm2582_vm11 = vcmask 1044480   ;;  %vm2557_vm13 = vcmask 105472  }
  0x2c   : > { %3994 = vmatpush3.msra.mxu0 %v359_v16  ;;  %v343_v20 = vld [vmem:[%s4690_s7 + $0x8] sm:$0xff]  ;;  %3997 = vmatprep.mubr.msk.f32.mxu0 %vm365_vm0, %v342_v19  ;;  %v346_v24 = vld [vmem:[%s4690_s7 + $0x20] sm:$0xff]  ;;  %v348_v26 = vld [vmem:[%s4690_s7 + $0x30] sm:$0xff]  ;;  %s4576_s9 = smov [#allocation4]  }
  0x2d   : > { %3995 = vmatprep.subr.mxu0 %v358_v17  ;;  %v347_v25 = vld [vmem:[%s4690_s7 + $0x28] sm:$0xff]  ;;  %v349_v27 = vld [vmem:[%s4690_s7 + $0x38] sm:$0xff]  ;;  %v4717_v29 = vld [vmem:[%s5416_s2 + $0x20] sm:$0xff] }
  0x2e   : > { %3996 = vmatpush3.msra.mxu0 %v358_v17  ;;  %v520_v28 = vld [vmem:[%s5416_s2 + $0x18] sm:$0xff]  ;;  %v519_v30 = vld [vmem:[%s5416_s2 + $0x10] sm:$0xff]  ;;  %v3720_v31 = vld [vmem:[%s5417_s3] ss:$0 sm:$0xff] }
  0x2f   : > { %3998 = vmatmul.mubr.msk.f32.vlgmr.msra.gmra.mxu0 %vm365_vm0, %v343_v20  ;;  %4025 = vmatprep.subr.mxu0 %v4566_v22  ;;  %v4754_v3 = vld [vmem:[%s5417_s3 + $0x1] ss:$0 sm:$0xff] }
  0x30   : > { %4000 = vmatprep.mubr.msk.f32.mxu0 %vm365_vm0, %v344_v21  ;;  %4026 = vmatpush3.msra.mxu0 %v4687_v18 }
  0x31   : > { %4027 = vmatprep.subr.mxu0 %v4566_v22  ;;  %4009 = vmatprep.subr.mxu1 %v520_v28 }
  0x32   : > { %4028 = vmatpush3.msra.mxu0 %v4717_v29  ;;  %4010 = vmatpush3.msra.mxu1 %v520_v28 }
  0x33   : > { %4001 = vmatmul.mubr.msk.f32.gmra.mxu0 %vm365_vm0, %v345_v23  ;;  %4039 = vmatprep.subr.mxu0 %v4566_v22 }
  0x34   : > { %4003 = vmatprep.mubr.msk.f32.mxu0 %vm365_vm0, %v346_v24  ;;  %4011 = vmatprep.subr.mxu1 %v519_v30 }
  0x35   : > { %4012 = vmatpush3.msra.mxu1 %v519_v30 }
  0x36   : > { %4032 = vmatprep.subr.mxu1 %v4566_v22 }
  0x37   : > { %4004 = vmatmul.mubr.msk.f32.gmra.mxu0 %vm365_vm0, %v347_v25 }
  0x38   : > { %4006 = vmatprep.mubr.msk.f32.mxu0 %vm365_vm0, %v348_v26 }
  0x3b   : > { %4007 = vmatmul.mubr.msk.f32.gmra.mxu0 %vm365_vm0, %v349_v27 }
  0x3c   : > { %4029 = vmatprep.mubr.msk.f32.mxu0 %vm4567_vm1, %v4566_v22 }
  0x3f   : > { %4030 = vmatmul.mubr.f32.vlgmr.msra.gmra.mxu0 %v4566_v22 }
  0x40   : > { %4040 = vmatpush3.msra.mxu0 %v4687_v18  ;;  %4043 = vmatprep.mubr.msk.f32.mxu0 %vm4567_vm1, %v4566_v22 }
  0x41   : > { %4041 = vmatprep.subr.mxu0 %v4566_v22 }
  0x42   : > { %4042 = vmatpush3.msra.mxu0 %v4717_v29 }
  0x43   : > { %4053 = vmatprep.subr.mxu0 %v4566_v22 }
  0xef   : > { %v3999_v32 = vpop.f32.mrf.mxu0 }
  0xf0   : > { %v462_v33 = vadd.f32 %v3999_v32, %v3720_v31 }
  0xf1   : > { %v456_v34 = vpop.f32.mrf.mxu0 }
  0xf2   : > { %v457_v35 = vadd.f32 %v3720_v31, %v456_v34  ;;  %v504_v36 = vmul.f32 0.01, %v462_v33  ;;  %vm496_vm2 = vcmp.gt.f32.partialorder %v462_v33, 0.0 }
  0xf3   : > { %v4002_v37 = vpop.f32.mrf.mxu0 }
  0xf4   : > { %vm495_vm3 = vcmp.gt.f32.partialorder %v457_v35, 0.0  ;;  %v503_v38 = vmul.f32 0.01, %v457_v35  ;;  %v472_v39 = vadd.f32 %v4002_v37, %v3720_v31  ;;  %v512_v44 = vsel %vm496_vm2, %v462_v33, %v504_v36 }
  0xf5   : > { %v466_v40 = vpop.f32.mrf.mxu0 }
  0xf6   : > { %v511_v41 = vsel %vm495_vm3, %v457_v35, %v503_v38  ;;  %vm498_vm4 = vcmp.gt.f32.partialorder %v472_v39, 0.0  ;;  %v506_v42 = vmul.f32 0.01, %v472_v39  ;;  %v467_v43 = vadd.f32 %v3720_v31, %v466_v40 }
  0xf7   : > { %4013 = vmatprep.mubr.msk.f32.mxu1 %vm365_vm0, %v511_v41  ;;  %v4005_v45 = vpop.f32.mrf.mxu0 }
  0xf8   : > { %4014 = vmatmul.mubr.msk.f32.vlgmr.msra.gmra.mxu1 %vm365_vm0, %v512_v44  ;;  %vm497_vm5 = vcmp.gt.f32.partialorder %v467_v43, 0.0  ;;  %v505_v46 = vmul.f32 0.01, %v467_v43  ;;  %v482_v47 = vadd.f32 %v4005_v45, %v3720_v31  ;;  %v514_v49 = vsel %vm498_vm4, %v472_v39, %v506_v42 }
  0xf9   : > { %v476_v48 = vpop.f32.mrf.mxu0  ;;  %4033 = vmatpush3.msra.mxu1 %v4687_v18 }
  0xfa   : > { %vm500_vm6 = vcmp.gt.f32.partialorder %v482_v47, 0.0  ;;  %v508_v50 = vmul.f32 0.01, %v482_v47  ;;  %v477_v51 = vadd.f32 %v3720_v31, %v476_v48  ;;  %v513_v52 = vsel %vm497_vm5, %v467_v43, %v505_v46  ;;  %4034 = vmatprep.subr.mxu1 %v4566_v22 }
  0xfb   : > { %4016 = vmatprep.mubr.msk.f32.mxu1 %vm365_vm0, %v513_v52  ;;  %4035 = vmatpush3.msra.mxu1 %v4717_v29  ;;  %v4008_v56 = vpop.f32.mrf.mxu0 }
  0xfc   : > { %vm499_vm7 = vcmp.gt.f32.partialorder %v477_v51, 0.0  ;;  %v507_v53 = vmul.f32 0.01, %v477_v51  ;;  %4017 = vmatmul.mubr.msk.f32.gmra.mxu1 %vm365_vm0, %v514_v49  ;;  %4046 = vmatprep.subr.mxu1 %v4566_v22  ;;  %v516_v54 = vsel %vm500_vm6, %v482_v47, %v508_v50  ;;  %v492_v57 = vadd.f32 %v4008_v56, %v3720_v31 }
  0xfd   : > { %v486_v58 = vpop.f32.mrf.mxu0 }
  0xfe   : > { %v515_v55 = vsel %vm499_vm7, %v477_v51, %v507_v53  ;;  %v487_v59 = vadd.f32 %v3720_v31, %v486_v58  ;;  %v510_v60 = vmul.f32 0.01, %v492_v57  ;;  %vm502_vm8 = vcmp.gt.f32.partialorder %v492_v57, 0.0 }
  0xff   : > { %4019 = vmatprep.mubr.msk.f32.mxu1 %vm365_vm0, %v515_v55  ;;  %v726_v0 = vpop.f32.mrf.mxu0 }
 0x100   : > { %4020 = vmatmul.mubr.msk.f32.gmra.mxu1 %vm365_vm0, %v516_v54  ;;  %vm501_vm9 = vcmp.gt.f32.partialorder %v487_v59, 0.0  ;;  %v509_v61 = vmul.f32 0.01, %v487_v59  ;;  %v518_v63 = vsel %vm502_vm8, %v492_v57, %v510_v60 }
 0x101   : > { %v4031_v1 = vpop.f32.mrf.mxu0 }
 0x102   : > { %v517_v62 = vsel %vm501_vm9, %v487_v59, %v509_v61 }
 0x103   : > { %4022 = vmatprep.mubr.msk.f32.mxu1 %vm365_vm0, %v517_v62 }
 0x104   : > { %4023 = vmatmul.mubr.msk.f32.gmra.mxu1 %vm365_vm0, %v518_v63 }
 0x105   : > { %4036 = vmatprep.mubr.msk.f32.mxu1 %vm4567_vm1, %v4566_v22 }
 0x1b8   : > { %v4015_v2 = vpop.f32.mrf.mxu1 }
 0x1b9   : > { %v622_v30 = vadd.f32 %v4015_v2, %v4754_v3 }
 0x1ba   : > { %v616_v4 = vpop.f32.mrf.mxu1 }
 0x1bb   : > { %v617_v5 = vadd.f32 %v4754_v3, %v616_v4 }
 0x1bc   : > { %v4771_v23 = vpop.f32.mrf.mxu1 }
 0x1bd   : > { %v730_v6 = vadd.f32 %v726_v0, %v617_v5  ;;  %v632_v2 = vadd.f32 %v4771_v23, %v4754_v3 }
 0x1be   : > { %v626_v24 = vpop.f32.mrf.mxu1 }
 0x1bf   : > { %4320 = vtanh.f32 %v730_v6  ;;  %v3738_v8 = vmul.f32 -1.442695, %v730_v6  ;;  %v627_v48 = vadd.f32 %v4754_v3, %v626_v24 }
 0x1c0   : > { %v4773_v25 = vpop.f32.mrf.mxu1 }
 0x1c1   : > { %4322 = vpow2.f32 %v3738_v8 }
 0x1c2   : > { %v4775_v26 = vpop.f32.mrf.mxu1 }
 0x1c3   : > { %v637_v24 = vadd.f32 %v4754_v3, %v4775_v26 }
 0x1c4   : > { %v4777_v27 = vpop.f32.mrf.mxu1 }
 0x1c6   : > { %v4779_v28 = vpop.f32.mrf.mxu1 }
 0x1cc   : > { %v4321_v7 = vpop.eup %4320 }
 0x1cd   : > { %740 = vrot.lane.b32.xlu0 %v4321_v7, %s4568_s25 }
 0x1ce   : > { %v4323_v9 = vpop.eup %4322 }
 0x1cf   : > { %v734_v10 = vadd.f32 1.0, %v4323_v9 }
 0x1d1   : > { %4324 = vrcp.f32 %v734_v10 }
 0x1de   : > { %v4325_v11 = vpop.eup %4324 }
 0x1df   : > { %v738_v14 = vmul.f32 0.0, %v4325_v11 }
 0x23f   : > { %v741_v12 = vpop.permute.xlu0 %740 }
 0x240   : > { %v743_v13 = vmul.f32 %v4325_v11, %v741_v12 }
 0x242   : > { %745 = vrot.lane.b32.xlu0 %v743_v13, %s4569_s28 }
 0x2b4   : > { %v746_v15 = vpop.permute.xlu0 %745 }
 0x2b5   : > { %v748_v16 = vadd.f32 %v746_v15, %v738_v14 }
 0x2b7   : > { %4326 = vtanh.f32 %v748_v16 }
 0x2c4   : > { %v4327_v17 = vpop.eup %4326 }
 0x2c5   : > { %751 = vrot.lane.b32.xlu1 %v4327_v17, %s4570_s5 }
 0x337   : > { %v752_v19 = vpop.permute.xlu1 %751 }
 0x338   : > { %v754_v20 = vmul.f32 %v4325_v11, %v752_v19 }
 0x33a   : > { %756 = vrot.lane.b32.xlu1 %v754_v20, %s4571_s6 }
 0x3ac   : > { %v4761_v21 = vpop.permute.xlu1 %756 }
 0x3ad   : > { %4037 = vmatmul.mubr.msk.f32.vlgmr.msra.gmra.mxu1 %vm365_vm0, %v4761_v21 }
 0x3ae   : > { %4047 = vmatpush3.msra.mxu1 %v4687_v18  ;;  %4050 = vmatprep.mubr.msk.f32.mxu1 %vm4567_vm1, %v4566_v22 }
 0x3af   : > { %4048 = vmatprep.subr.mxu1 %v4566_v22 }
 0x3b0   : > { %4049 = vmatpush3.msra.mxu1 %v4717_v29 }
 0x3b1   : > { %4060 = vmatprep.subr.mxu1 %v4566_v22 }
 0x46d   : > { %v826_v31 = vpop.f32.mrf.mxu1 }
 0x46e   : > { %v830_v32 = vadd.f32 %v826_v31, %v622_v30 }
 0x46f   : > { %v4038_v33 = vpop.f32.mrf.mxu1 }
 0x470   : > { %4328 = vtanh.f32 %v830_v32  ;;  %v3740_v35 = vmul.f32 -1.442695, %v830_v32 }
 0x472   : > { %4330 = vpow2.f32 %v3740_v35 }
 0x47d   : > { %v4329_v34 = vpop.eup %4328 }
 0x47e   : > { %840 = vrot.lane.b32.xlu0 %v4329_v34, %s4568_s25 }
 0x47f   : > { %v4331_v36 = vpop.eup %4330 }
 0x480   : > { %v834_v37 = vadd.f32 1.0, %v4331_v36 }
 0x482   : > { %4332 = vrcp.f32 %v834_v37 }
 0x48f   : > { %v4333_v38 = vpop.eup %4332 }
 0x490   : > { %v838_v41 = vmul.f32 %v4333_v38, %v748_v16 }
 0x4f0   : > { %v841_v39 = vpop.permute.xlu0 %840 }
 0x4f1   : > { %v843_v40 = vmul.f32 %v4333_v38, %v841_v39 }
 0x4f3   : > { %845 = vrot.lane.b32.xlu1 %v843_v40, %s4569_s28 }
 0x565   : > { %v846_v42 = vpop.permute.xlu1 %845 }
 0x566   : > { %v848_v43 = vadd.f32 %v846_v42, %v838_v41 }
 0x568   : > { %4334 = vtanh.f32 %v848_v43 }
 0x575   : > { %v4335_v44 = vpop.eup %4334 }
 0x576   : > { %851 = vrot.lane.b32.xlu0 %v4335_v44, %s4570_s5 }
 0x5e8   : > { %v852_v45 = vpop.permute.xlu0 %851 }
 0x5e9   : > { %v854_v46 = vmul.f32 %v4333_v38, %v852_v45 }
 0x5eb   : > { %856 = vrot.lane.b32.xlu1 %v854_v46, %s4571_s6  ;;  %v642_v46 = vadd.f32 %v4773_v25, %v4754_v3 }
 0x65d   : > { %v4786_v47 = vpop.permute.xlu1 %856 }
 0x65e   : > { %4044 = vmatmul.mubr.msk.f32.vlgmr.msra.gmra.mxu0 %vm365_vm0, %v4786_v47 }
 0x65f   : > { %4054 = vmatpush3.msra.mxu0 %v4687_v18  ;;  %4057 = vmatprep.mubr.msk.f32.mxu0 %vm4567_vm1, %v4566_v22 }
 0x660   : > { %4055 = vmatprep.subr.mxu0 %v4566_v22 }
 0x661   : > { %4056 = vmatpush3.msra.mxu0 %v4717_v29 }
 0x662   : > { %4067 = vmatprep.subr.mxu0 %v4566_v22 }
 0x71e   : > { %v926_v49 = vpop.f32.mrf.mxu0 }
 0x71f   : > { %v930_v50 = vadd.f32 %v926_v49, %v627_v48 }
 0x720   : > { %v4045_v51 = vpop.f32.mrf.mxu0 }
 0x721   : > { %4336 = vtanh.f32 %v930_v50  ;;  %v3742_v53 = vmul.f32 -1.442695, %v930_v50 }
 0x723   : > { %4338 = vpow2.f32 %v3742_v53 }
 0x72e   : > { %v4337_v52 = vpop.eup %4336 }
 0x72f   : > { %940 = vrot.lane.b32.xlu0 %v4337_v52, %s4568_s25 }
 0x730   : > { %v4339_v54 = vpop.eup %4338 }
 0x731   : > { %v934_v55 = vadd.f32 1.0, %v4339_v54 }
 0x733   : > { %4340 = vrcp.f32 %v934_v55 }
 0x740   : > { %v4341_v56 = vpop.eup %4340 }
 0x741   : > { %v938_v59 = vmul.f32 %v4341_v56, %v848_v43 }
 0x7a1   : > { %v941_v57 = vpop.permute.xlu0 %940 }
 0x7a2   : > { %v943_v58 = vmul.f32 %v4341_v56, %v941_v57 }
 0x7a4   : > { %945 = vrot.lane.b32.xlu1 %v943_v58, %s4569_s28 }
 0x816   : > { %v946_v60 = vpop.permute.xlu1 %945 }
 0x817   : > { %v948_v61 = vadd.f32 %v946_v60, %v938_v59  ;;  %v1456_v59 = vld [vmem:[%s5416_s2 + $0x38] sm:$0xff] }
 0x819   : > { %4342 = vtanh.f32 %v948_v61 }
 0x826   : > { %v4343_v62 = vpop.eup %4342 }
 0x827   : > { %951 = vrot.lane.b32.xlu0 %v4343_v62, %s4570_s5 }
 0x899   : > { %v952_v63 = vpop.permute.xlu0 %951 }
 0x89a   : > { %v954_v0 = vmul.f32 %v4341_v56, %v952_v63  ;;  %v1455_v63 = vld [vmem:[%s5416_s2 + $0x30] sm:$0xff] }
 0x89c   : > { %956 = vrot.lane.b32.xlu1 %v954_v0, %s4571_s6 }
 0x90e   : > { %v4801_v1 = vpop.permute.xlu1 %956 }
 0x90f   : > { %4051 = vmatmul.mubr.msk.f32.vlgmr.msra.gmra.mxu1 %vm365_vm0, %v4801_v1 }
 0x910   : > { %4061 = vmatpush3.msra.mxu1 %v4687_v18  ;;  %4064 = vmatprep.mubr.msk.f32.mxu1 %vm4567_vm1, %v4566_v22 }
 0x911   : > { %4062 = vmatprep.subr.mxu1 %v4566_v22 }
 0x912   : > { %4063 = vmatpush3.msra.mxu1 %v4717_v29 }
 0x913   : > { %4074 = vmatprep.subr.mxu1 %v4566_v22 }
 0x9cf   : > { %v1026_v4 = vpop.f32.mrf.mxu1 }
 0x9d0   : > { %v1030_v5 = vadd.f32 %v1026_v4, %v632_v2 }
 0x9d1   : > { %v4052_v6 = vpop.f32.mrf.mxu1 }
 0x9d2   : > { %4344 = vtanh.f32 %v1030_v5  ;;  %v3744_v8 = vmul.f32 -1.442695, %v1030_v5 }
 0x9d4   : > { %4346 = vpow2.f32 %v3744_v8 }
 0x9df   : > { %v4345_v7 = vpop.eup %4344 }
 0x9e0   : > { %1040 = vrot.lane.b32.xlu0 %v4345_v7, %s4568_s25 }
 0x9e1   : > { %v4347_v9 = vpop.eup %4346 }
 0x9e2   : > { %v1034_v10 = vadd.f32 1.0, %v4347_v9 }
 0x9e4   : > { %4348 = vrcp.f32 %v1034_v10 }
 0x9f1   : > { %v4349_v11 = vpop.eup %4348 }
 0x9f2   : > { %v1038_v14 = vmul.f32 %v4349_v11, %v948_v61 }
 0xa52   : > { %v1041_v12 = vpop.permute.xlu0 %1040 }
 0xa53   : > { %v1043_v13 = vmul.f32 %v4349_v11, %v1041_v12 }
 0xa55   : > { %1045 = vrot.lane.b32.xlu1 %v1043_v13, %s4569_s28  ;;  %v4874_v13 = vld [vmem:[%s5416_s2 + $0x48] sm:$0xff] }
 0xac7   : > { %v1046_v15 = vpop.permute.xlu1 %1045 }
 0xac8   : > { %v1048_v16 = vadd.f32 %v1046_v15, %v1038_v14  ;;  %v4880_v14 = vld [vmem:[%s5416_s2 + $0x40] sm:$0xff] }
 0xaca   : > { %4350 = vtanh.f32 %v1048_v16 }
 0xad7   : > { %v4351_v17 = vpop.eup %4350 }
 0xad8   : > { %1051 = vrot.lane.b32.xlu0 %v4351_v17, %s4570_s5 }
 0xb4a   : > { %v1052_v19 = vpop.permute.xlu0 %1051 }
 0xb4b   : > { %v1054_v20 = vmul.f32 %v4349_v11, %v1052_v19 }
 0xb4d   : > { %1056 = vrot.lane.b32.xlu1 %v1054_v20, %s4571_s6  ;;  %v652_v20 = vadd.f32 %v4777_v27, %v4754_v3 }
 0xbbf   : > { %v4817_v23 = vpop.permute.xlu1 %1056 }
 0xbc0   : > { %4058 = vmatmul.mubr.msk.f32.vlgmr.msra.gmra.mxu0 %vm365_vm0, %v4817_v23 }
 0xbc1   : > { %4068 = vmatpush3.msra.mxu0 %v4687_v18  ;;  %4071 = vmatprep.mubr.msk.f32.mxu0 %vm4567_vm1, %v4566_v22 }
 0xbc2   : > { %4069 = vmatprep.subr.mxu0 %v4566_v22 }
 0xbc3   : > { %4070 = vmatpush3.msra.mxu0 %v4717_v29 }
 0xbc4   : > { %4081 = vmatprep.subr.mxu0 %v1456_v59 }
 0xc80   : > { %v1126_v30 = vpop.f32.mrf.mxu0 }
 0xc81   : > { %v1130_v31 = vadd.f32 %v1126_v30, %v637_v24 }
 0xc82   : > { %v4059_v32 = vpop.f32.mrf.mxu0 }
 0xc83   : > { %4352 = vtanh.f32 %v1130_v31  ;;  %v3746_v34 = vmul.f32 -1.442695, %v1130_v31  ;;  %v4908_v31 = vld [vmem:[%s5417_s3 + $0x2] ss:$0 sm:$0xff] }
 0xc85   : > { %4354 = vpow2.f32 %v3746_v34 }
 0xc90   : > { %v4353_v33 = vpop.eup %4352 }
 0xc91   : > { %1140 = vrot.lane.b32.xlu0 %v4353_v33, %s4568_s25 }
 0xc92   : > { %v4355_v35 = vpop.eup %4354 }
 0xc93   : > { %v1134_v36 = vadd.f32 1.0, %v4355_v35 }
 0xc95   : > { %4356 = vrcp.f32 %v1134_v36 }
 0xca2   : > { %v4357_v37 = vpop.eup %4356 }
 0xca3   : > { %v1138_v40 = vmul.f32 %v4357_v37, %v1048_v16 }
 0xd03   : > { %v1141_v38 = vpop.permute.xlu0 %1140 }
 0xd04   : > { %v1143_v39 = vmul.f32 %v4357_v37, %v1141_v38 }
 0xd06   : > { %1145 = vrot.lane.b32.xlu1 %v1143_v39, %s4569_s28 }
 0xd78   : > { %v1146_v41 = vpop.permute.xlu1 %1145 }
 0xd79   : > { %v1148_v26 = vadd.f32 %v1146_v41, %v1138_v40 }
 0xd7b   : > { %4358 = vtanh.f32 %v1148_v26 }
 0xd88   : > { %v4359_v42 = vpop.eup %4358 }
 0xd89   : > { %1151 = vrot.lane.b32.xlu0 %v4359_v42, %s4570_s5 }
 0xdfb   : > { %v1152_v43 = vpop.permute.xlu0 %1151 }
 0xdfc   : > { %v1154_v44 = vmul.f32 %v4357_v37, %v1152_v43 }
 0xdfe   : > { %1156 = vrot.lane.b32.xlu1 %v1154_v44, %s4571_s6 }
 0xe70   : > { %v1157_v45 = vpop.permute.xlu1 %1156 }
 0xe71   : > { %4065 = vmatmul.mubr.msk.f32.vlgmr.msra.gmra.mxu1 %vm365_vm0, %v1157_v45 }
 0xe72   : > { %4075 = vmatpush3.msra.mxu1 %v4687_v18  ;;  %4078 = vmatprep.mubr.msk.f32.mxu1 %vm4567_vm1, %v4566_v22 }
 0xe73   : > { %4076 = vmatprep.subr.mxu1 %v4566_v22 }
 0xe74   : > { %4077 = vmatpush3.msra.mxu1 %v4717_v29 }
 0xe75   : > { %4097 = vmatprep.subr.mxu1 %v4566_v22 }
 0xf31   : > { %v1226_v48 = vpop.f32.mrf.mxu1 }
 0xf32   : > { %v1230_v49 = vadd.f32 %v1226_v48, %v642_v46 }
 0xf33   : > { %v4066_v50 = vpop.f32.mrf.mxu1 }
 0xf34   : > { %4360 = vtanh.f32 %v1230_v49  ;;  %v3748_v18 = vmul.f32 -1.442695, %v1230_v49 }
 0xf36   : > { %4362 = vpow2.f32 %v3748_v18 }
 0xf41   : > { %v4361_v51 = vpop.eup %4360 }
 0xf42   : > { %1240 = vrot.lane.b32.xlu0 %v4361_v51, %s4568_s25 }
 0xf43   : > { %v4363_v52 = vpop.eup %4362 }
 0xf44   : > { %v1234_v53 = vadd.f32 1.0, %v4363_v52 }
 0xf46   : > { %4364 = vrcp.f32 %v1234_v53 }
 0xf53   : > { %v4365_v54 = vpop.eup %4364 }
 0xf54   : > { %v1238_v56 = vmul.f32 %v4365_v54, %v1148_v26 }
 0xfb4   : > { %v1241_v55 = vpop.permute.xlu0 %1240 }
 0xfb5   : > { %v1243_v29 = vmul.f32 %v4365_v54, %v1241_v55 }
 0xfb7   : > { %1245 = vrot.lane.b32.xlu1 %v1243_v29, %s4569_s28 }
0x1029   : > { %v1246_v57 = vpop.permute.xlu1 %1245 }
0x102a   : > { %v1248_v25 = vadd.f32 %v1246_v57, %v1238_v56 }
0x102c   : > { %4366 = vtanh.f32 %v1248_v25 }
0x1039   : > { %v4367_v58 = vpop.eup %4366 }
0x103a   : > { %1251 = vrot.lane.b32.xlu0 %v4367_v58, %s4570_s5 }
0x10ac   : > { %v1252_v60 = vpop.permute.xlu0 %1251 }
0x10ad   : > { %v1254_v61 = vmul.f32 %v4365_v54, %v1252_v60 }
0x10af   : > { %1256 = vrot.lane.b32.xlu1 %v1254_v61, %s4571_s6 }
0x1121   : > { %v1257_v62 = vpop.permute.xlu1 %1256 }
0x1122   : > { %4072 = vmatmul.mubr.msk.f32.vlgmr.msra.gmra.mxu0 %vm365_vm0, %v1257_v62 }
0x1123   : > { %4082 = vmatpush3.msra.mxu0 %v1456_v59  ;;  %4085 = vmatprep.mubr.msk.f32.mxu0 %vm365_vm0, %v4761_v21  ;;  %v647_v21 = vadd.f32 %v4754_v3, %v4779_v28 }
0x1124   : > { %4083 = vmatprep.subr.mxu0 %v1455_v63 }
0x1125   : > { %4084 = vmatpush3.msra.mxu0 %v1455_v63 }
0x1126   : > { %4086 = vmatmul.mubr.msk.f32.vlgmr.msra.gmra.mxu0 %vm365_vm0, %v4786_v47  ;;  %4125 = vmatprep.subr.mxu0 %v4566_v22 }
0x1127   : > { %4088 = vmatprep.mubr.msk.f32.mxu0 %vm365_vm0, %v4801_v1  ;;  %4126 = vmatpush3.msra.mxu0 %v4874_v13 }
0x1128   : > { %4127 = vmatprep.subr.mxu0 %v4566_v22 }
0x1129   : > { %4128 = vmatpush3.msra.mxu0 %v4880_v14 }
0x112a   : > { %4089 = vmatmul.mubr.msk.f32.gmra.mxu0 %vm365_vm0, %v4817_v23  ;;  %4139 = vmatprep.subr.mxu0 %v4566_v22 }
0x112b   : > { %4091 = vmatprep.mubr.msk.f32.mxu0 %vm365_vm0, %v1157_v45 }
0x112e   : > { %4092 = vmatmul.mubr.msk.f32.gmra.mxu0 %vm365_vm0, %v1257_v62 }
0x11e2   : > { %v1326_v0 = vpop.f32.mrf.mxu0 }
0x11e3   : > { %v1330_v2 = vadd.f32 %v1326_v0, %v647_v21 }
0x11e4   : > { %v4073_v4 = vpop.f32.mrf.mxu0 }
0x11e5   : > { %4368 = vtanh.f32 %v1330_v2  ;;  %v3750_v5 = vmul.f32 -1.442695, %v1330_v2 }
0x11e6   : > { %v4087_v19 = vpop.f32.mrf.mxu0 }
0x11e7   : > { %4370 = vpow2.f32 %v3750_v5  ;;  %v1539_v49 = vadd.f32 %v4087_v19, %v4908_v31 }
0x11e8   : > { %v1533_v23 = vpop.f32.mrf.mxu0 }
0x11e9   : > { %v1534_v33 = vadd.f32 %v4908_v31, %v1533_v23 }
0x11ea   : > { %v4090_v21 = vpop.f32.mrf.mxu0 }
0x11ec   : > { %v1543_v0 = vpop.f32.mrf.mxu0 }
0x11ed   : > { %v1544_v2 = vadd.f32 %v4908_v31, %v1543_v0 }
0x11f2   : > { %v4369_v47 = vpop.eup %4368 }
0x11f3   : > { %1340 = vrot.lane.b32.xlu0 %v4369_v47, %s4568_s25 }
0x11f4   : > { %v4371_v1 = vpop.eup %4370 }
0x11f5   : > { %v1334_v6 = vadd.f32 1.0, %v4371_v1 }
0x11f7   : > { %4372 = vrcp.f32 %v1334_v6 }
0x1204   : > { %v4373_v7 = vpop.eup %4372 }
0x1205   : > { %v1338_v10 = vmul.f32 %v4373_v7, %v1248_v25 }
0x1265   : > { %v1341_v8 = vpop.permute.xlu0 %1340 }
0x1266   : > { %v1343_v9 = vmul.f32 %v4373_v7, %v1341_v8 }
0x1268   : > { %1345 = vrot.lane.b32.xlu1 %v1343_v9, %s4569_s28 }
0x12da   : > { %v1346_v11 = vpop.permute.xlu1 %1345 }
0x12db   : > { %v4867_v28 = vadd.f32 %v1346_v11, %v1338_v10 }
0x12dd   : > { %4374 = vtanh.f32 %v4867_v28 }
0x12ea   : > { %v4375_v12 = vpop.eup %4374 }
0x12eb   : > { %1351 = vrot.lane.b32.xlu0 %v4375_v12, %s4570_s5 }
0x135d   : > { %v1352_v15 = vpop.permute.xlu0 %1351 }
0x135e   : > { %v1354_v16 = vmul.f32 %v4373_v7, %v1352_v15 }
0x1360   : > { %1356 = vrot.lane.b32.xlu1 %v1354_v16, %s4571_s6 }
0x13d2   : > { %v1357_v17 = vpop.permute.xlu1 %1356 }
0x13d3   : > { %4079 = vmatmul.mubr.msk.f32.vlgmr.msra.gmra.mxu1 %vm365_vm0, %v1357_v17  ;;  %4094 = vmatprep.mubr.msk.f32.mxu0 %vm365_vm0, %v1357_v17 }
0x13d4   : > { %4098 = vmatpush3.msra.mxu1 %v4874_v13  ;;  %4101 = vmatprep.mubr.msk.f32.mxu1 %vm4567_vm1, %v4566_v22 }
0x13d5   : > { %4099 = vmatprep.subr.mxu1 %v4566_v22 }
0x13d6   : > { %4100 = vmatpush3.msra.mxu1 %v4880_v14 }
0x13d7   : > { %4102 = vmatmul.mubr.f32.vlgmr.msra.gmra.mxu1 %v4566_v22  ;;  %4104 = vmatprep.subr.mxu1 %v4566_v22 }
0x13d8   : > { %4105 = vmatpush3.msra.mxu1 %v4874_v13  ;;  %4108 = vmatprep.mubr.msk.f32.mxu1 %vm4567_vm1, %v4566_v22 }
0x13d9   : > { %4106 = vmatprep.subr.mxu1 %v4566_v22 }
0x13da   : > { %4107 = vmatpush3.msra.mxu1 %v4880_v14 }
0x13db   : > { %4111 = vmatprep.subr.mxu1 %v4566_v22 }
0x1493   : > { %v1426_v24 = vpop.f32.mrf.mxu1 }
0x1494   : > { %v4903_v30 = vadd.f32 %v1426_v24, %v652_v20 }
0x1495   : > { %v4080_v32 = vpop.f32.mrf.mxu1 }
0x1496   : > { %v3752_v20 = vmul.f32 -1.442695, %v4903_v30 }
0x1497   : > { %v1640_v34 = vpop.f32.mrf.mxu1 }
0x1498   : > { %v1644_v35 = vadd.f32 %v1640_v34, %v1534_v33 }
0x1499   : > { %v4103_v36 = vpop.f32.mrf.mxu1 }
0x149a   : > { %4376 = vtanh.f32 %v1644_v35  ;;  %v3762_v3 = vmul.f32 -1.442695, %v1644_v35 }
0x149c   : > { %4378 = vpow2.f32 %v3762_v3 }
0x14a7   : > { %v4377_v37 = vpop.eup %4376 }
0x14a8   : > { %1654 = vrot.lane.b32.xlu0 %v4377_v37, %s4568_s25 }
0x14a9   : > { %v4379_v27 = vpop.eup %4378 }
0x14aa   : > { %v1648_v38 = vadd.f32 1.0, %v4379_v27 }
0x14ac   : > { %4380 = vrcp.f32 %v1648_v38 }
0x14b9   : > { %v4381_v39 = vpop.eup %4380 }
0x14ba   : > { %v1652_v26 = vmul.f32 0.0, %v4381_v39 }
0x151a   : > { %v1655_v40 = vpop.permute.xlu0 %1654 }
0x151b   : > { %v1657_v41 = vmul.f32 %v4381_v39, %v1655_v40 }
0x151d   : > { %1659 = vrot.lane.b32.xlu1 %v1657_v41, %s4569_s28  ;;  %v1549_v41 = vadd.f32 %v4090_v21, %v4908_v31 }
0x158f   : > { %v1660_v42 = vpop.permute.xlu1 %1659 }
0x1590   : > { %v1662_v43 = vadd.f32 %v1660_v42, %v1652_v26 }
0x1592   : > { %4382 = vtanh.f32 %v1662_v43 }
0x159f   : > { %v4383_v44 = vpop.eup %4382 }
0x15a0   : > { %1665 = vrot.lane.b32.xlu0 %v4383_v44, %s4570_s5 }
0x1612   : > { %v1666_v45 = vpop.permute.xlu0 %1665 }
0x1613   : > { %v1668_v46 = vmul.f32 %v4381_v39, %v1666_v45 }
0x1615   : > { %1670 = vrot.lane.b32.xlu1 %v1668_v46, %s4571_s6 }
0x1687   : > { %v4915_v48 = vpop.permute.xlu1 %1670 }
0x1688   : > { %4109 = vmatmul.mubr.msk.f32.vlgmr.msra.gmra.mxu1 %vm365_vm0, %v4915_v48 }
0x1689   : > { %4112 = vmatpush3.msra.mxu1 %v4874_v13  ;;  %4115 = vmatprep.mubr.msk.f32.mxu1 %vm4567_vm1, %v4566_v22 }
0x168a   : > { %4113 = vmatprep.subr.mxu1 %v4566_v22 }
0x168b   : > { %4114 = vmatpush3.msra.mxu1 %v4880_v14 }
0x168c   : > { %4118 = vmatprep.subr.mxu1 %v4566_v22 }
0x1748   : > { %v1740_v50 = vpop.f32.mrf.mxu1 }
0x1749   : > { %v1744_v51 = vadd.f32 %v1740_v50, %v1539_v49 }
0x174a   : > { %v4110_v18 = vpop.f32.mrf.mxu1 }
0x174b   : > { %4384 = vtanh.f32 %v1744_v51  ;;  %v3764_v53 = vmul.f32 -1.442695, %v1744_v51 }
0x174d   : > { %4386 = vpow2.f32 %v3764_v53 }
0x1758   : > { %v4385_v52 = vpop.eup %4384 }
0x1759   : > { %1754 = vrot.lane.b32.xlu0 %v4385_v52, %s4568_s25 }
0x175a   : > { %v4387_v54 = vpop.eup %4386 }
0x175b   : > { %v1748_v55 = vadd.f32 1.0, %v4387_v54 }
0x175d   : > { %4388 = vrcp.f32 %v1748_v55 }
0x176a   : > { %v4389_v29 = vpop.eup %4388 }
0x176b   : > { %v1752_v25 = vmul.f32 %v4389_v29, %v1662_v43 }
0x17cb   : > { %v1755_v56 = vpop.permute.xlu0 %1754 }
0x17cc   : > { %v1757_v57 = vmul.f32 %v4389_v29, %v1755_v56 }
0x17ce   : > { %1759 = vrot.lane.b32.xlu1 %v1757_v57, %s4569_s28 }
0x1840   : > { %v1760_v58 = vpop.permute.xlu1 %1759 }
0x1841   : > { %v1762_v59 = vadd.f32 %v1760_v58, %v1752_v25  ;;  %v4093_v25 = vpop.f32.mrf.mxu0 }
0x1843   : > { %4390 = vtanh.f32 %v1762_v59  ;;  %v1553_v58 = vpop.f32.mrf.mxu0 }
0x1850   : > { %v4391_v60 = vpop.eup %4390 }
0x1851   : > { %1765 = vrot.lane.b32.xlu0 %v4391_v60, %s4570_s5 }
0x18c3   : > { %v1766_v61 = vpop.permute.xlu0 %1765 }
0x18c4   : > { %v1768_v62 = vmul.f32 %v4389_v29, %v1766_v61  ;;  %v1554_v61 = vadd.f32 %v4908_v31, %v1553_v58 }
0x18c6   : > { %1770 = vrot.lane.b32.xlu1 %v1768_v62, %s4571_s6 }
0x1938   : > { %v4930_v63 = vpop.permute.xlu1 %1770 }
0x1939   : > { %4116 = vmatmul.mubr.msk.f32.vlgmr.msra.gmra.mxu1 %vm365_vm0, %v4930_v63 }
0x193a   : > { %4119 = vmatpush3.msra.mxu1 %v4874_v13  ;;  %4122 = vmatprep.mubr.msk.f32.mxu1 %vm4567_vm1, %v4566_v22 }
0x193b   : > { %4120 = vmatprep.subr.mxu1 %v4566_v22 }
0x193c   : > { %4121 = vmatpush3.msra.mxu1 %v4880_v14 }
0x193d   : > { %4132 = vmatprep.subr.mxu1 %v4566_v22 }
0x19f9   : > { %v1840_v4 = vpop.f32.mrf.mxu1 }
0x19fa   : > { %v1844_v47 = vadd.f32 %v1840_v4, %v1544_v2 }
0x19fb   : > { %v4117_v5 = vpop.f32.mrf.mxu1 }
0x19fc   : > { %4392 = vtanh.f32 %v1844_v47  ;;  %v3766_v6 = vmul.f32 -1.442695, %v1844_v47 }
0x19fe   : > { %4394 = vpow2.f32 %v3766_v6 }
0x1a09   : > { %v4393_v1 = vpop.eup %4392 }
0x1a0a   : > { %1854 = vrot.lane.b32.xlu0 %v4393_v1, %s4568_s25 }
0x1a0b   : > { %v4395_v7 = vpop.eup %4394 }
0x1a0c   : > { %v1848_v8 = vadd.f32 1.0, %v4395_v7 }
0x1a0e   : > { %4396 = vrcp.f32 %v1848_v8 }
0x1a1b   : > { %v4397_v9 = vpop.eup %4396 }
0x1a1c   : > { %v1852_v12 = vmul.f32 %v4397_v9, %v1762_v59 }
0x1a7c   : > { %v1855_v10 = vpop.permute.xlu0 %1854 }
0x1a7d   : > { %v1857_v11 = vmul.f32 %v4397_v9, %v1855_v10 }
0x1a7f   : > { %1859 = vrot.lane.b32.xlu1 %v1857_v11, %s4569_s28 }
0x1af1   : > { %v1860_v15 = vpop.permute.xlu1 %1859 }
0x1af2   : > { %v1862_v16 = vadd.f32 %v1860_v15, %v1852_v12 }
0x1af4   : > { %4398 = vtanh.f32 %v1862_v16 }
0x1af5   : > { %4400 = vtanh.f32 %v4903_v30 }
0x1af6   : > { %4402 = vpow2.f32 %v3752_v20 }
0x1b01   : > { %v4399_v17 = vpop.eup %4398 }
0x1b02   : > { %1865 = vrot.lane.b32.xlu0 %v4399_v17, %s4570_s5  ;;  %v4401_v19 = vpop.eup %4400  ;;  %v1559_v17 = vadd.f32 %v4093_v25, %v4908_v31 }
0x1b03   : > { %v4403_v23 = vpop.eup %4402 }
0x1b04   : > { %v1434_v24 = vadd.f32 1.0, %v4403_v23 }
0x1b06   : > { %1440 = vrot.lane.b32.xlu0 %v4401_v19, %s4568_s25  ;;  %4404 = vrcp.f32 %v1434_v24 }
0x1b13   : > { %v4405_v34 = vpop.eup %4404 }
0x1b14   : > { %v1438_v30 = vmul.f32 %v4405_v34, %v4867_v28 }
0x1b74   : > { %v1866_v32 = vpop.permute.xlu0 %1865 }
0x1b75   : > { %v1868_v33 = vmul.f32 %v4397_v9, %v1866_v32 }
0x1b77   : > { %1870 = vrot.lane.b32.xlu1 %v1868_v33, %s4571_s6 }
0x1b78   : > { %v1441_v35 = vpop.permute.xlu0 %1440 }
0x1b79   : > { %v1443_v36 = vmul.f32 %v4405_v34, %v1441_v35 }
0x1b7b   : > { %1445 = vrot.lane.b32.xlu0 %v1443_v36, %s4569_s28 }
0x1be9   : > { %v4949_v37 = vpop.permute.xlu1 %1870 }
0x1bea   : > { %4123 = vmatmul.mubr.msk.f32.vlgmr.msra.gmra.mxu1 %vm365_vm0, %v4949_v37 }
0x1beb   : > { %4133 = vmatpush3.msra.mxu1 %v4874_v13  ;;  %4136 = vmatprep.mubr.msk.f32.mxu1 %vm4567_vm1, %v4566_v22 }
0x1bec   : > { %4134 = vmatprep.subr.mxu1 %v4566_v22 }
0x1bed   : > { %v1446_v3 = vpop.permute.xlu0 %1445  ;;  %4135 = vmatpush3.msra.mxu1 %v4880_v14 }
0x1bee   : > { %v1448_v27 = vadd.f32 %v1446_v3, %v1438_v30  ;;  %4146 = vmatprep.subr.mxu1 %v4566_v22  ;;  %v2390_v3 = vld [vmem:[%s5416_s2 + $0x60] sm:$0xff] }
0x1bf0   : > { %4406 = vtanh.f32 %v1448_v27 }
0x1bfd   : > { %v4407_v38 = vpop.eup %4406 }
0x1bfe   : > { %1451 = vrot.lane.b32.xlu0 %v4407_v38, %s4570_s5 }
0x1c70   : > { %v1452_v39 = vpop.permute.xlu0 %1451 }
0x1c71   : > { %v1454_v40 = vmul.f32 %v4405_v34, %v1452_v39 }
0x1c73   : > { %1463 = vrot.lane.b32.xlu0 %v1454_v40, %s4571_s6 }
0x1caa   : > { %v1940_v26 = vpop.f32.mrf.mxu1 }
0x1cab   : > { %v1944_v28 = vadd.f32 %v1940_v26, %v1549_v41  ;;  %v2389_v41 = vld [vmem:[%s5416_s2 + $0x58] sm:$0xff]  ;;  %v4496_v26 = vld [vmem:[%s4690_s7] sm:$0xff] }
0x1cac   : > { %v4124_v42 = vpop.f32.mrf.mxu1 }
0x1cad   : > { %4408 = vtanh.f32 %v1944_v28  ;;  %v3768_v45 = vmul.f32 -1.442695, %v1944_v28  ;;  %v2380_v28 = vsel %vm365_vm0, %v4915_v48, %v4496_v26  ;;  %v2388_v42 = vld [vmem:[%s5416_s2 + $0x50] sm:$0xff] }
0x1caf   : > { %4410 = vpow2.f32 %v3768_v45  ;;  %v4498_v45 = vld [vmem:[%s4690_s7 + $0x10] sm:$0xff] }
0x1cba   : > { %v4409_v43 = vpop.eup %4408 }
0x1cbb   : > { %1954 = vrot.lane.b32.xlu1 %v4409_v43, %s4568_s25  ;;  %v4497_v43 = vld [vmem:[%s4690_s7 + $0x8] sm:$0xff] }
0x1cbc   : > { %v4411_v46 = vpop.eup %4410 }
0x1cbd   : > { %v1948_v49 = vadd.f32 1.0, %v4411_v46  ;;  %v2382_v46 = vsel %vm365_vm0, %v4949_v37, %v4498_v45 }
0x1cbf   : > { %4412 = vrcp.f32 %v1948_v49  ;;  %v4499_v49 = vld [vmem:[%s4690_s7 + $0x18] sm:$0xff] }
0x1ccc   : > { %v4413_v50 = vpop.eup %4412 }
0x1ccd   : > { %v1952_v52 = vmul.f32 %v4413_v50, %v1862_v16 }
0x1ce5   : > { %v1464_v44 = vpop.permute.xlu0 %1463 }
0x1ce6   : > { %4095 = vmatmul.mubr.msk.f32.gmra.mxu0 %vm365_vm0, %v1464_v44  ;;  %v2381_v44 = vsel %vm365_vm0, %v4930_v63, %v4497_v43 }
0x1ce7   : > { %4129 = vmatprep.mubr.msk.f32.mxu0 %vm4567_vm1, %v4566_v22 }
0x1d2d   : > { %v1955_v51 = vpop.permute.xlu1 %1954 }
0x1d2e   : > { %v1957_v18 = vmul.f32 %v4413_v50, %v1955_v51  ;;  %v4500_v51 = vld [vmem:[%s4690_s7 + $0x20] sm:$0xff] }
0x1d30   : > { %1959 = vrot.lane.b32.xlu1 %v1957_v18, %s4569_s28 }
0x1da2   : > { %v1960_v53 = vpop.permute.xlu1 %1959 }
0x1da3   : > { %v1962_v54 = vadd.f32 %v1960_v53, %v1952_v52  ;;  %v4501_v52 = vld [vmem:[%s4690_s7 + $0x28] sm:$0xff] }
0x1da5   : > { %4414 = vtanh.f32 %v1962_v54 }
0x1da6   : > { %v4979_v59 = vpop.f32.mrf.mxu0 }
0x1da8   : > { %v4981_v60 = vpop.f32.mrf.mxu0 }
0x1db2   : > { %v4415_v55 = vpop.eup %4414 }
0x1db3   : > { %1965 = vrot.lane.b32.xlu1 %v4415_v55, %s4570_s5 }
0x1e25   : > { %v1966_v29 = vpop.permute.xlu1 %1965 }
0x1e26   : > { %v1968_v56 = vmul.f32 %v4413_v50, %v1966_v29 }
0x1e28   : > { %1970 = vrot.lane.b32.xlu1 %v1968_v56, %s4571_s6 }
0x1e9a   : > { %v4970_v57 = vpop.permute.xlu1 %1970 }
0x1e9b   : > { %4130 = vmatmul.mubr.msk.f32.vlgmr.msra.gmra.mxu0 %vm365_vm0, %v4970_v57  ;;  %v2383_v50 = vsel %vm365_vm0, %v4970_v57, %v4499_v49 }
0x1e9c   : > { %4140 = vmatpush3.msra.mxu0 %v4874_v13  ;;  %4143 = vmatprep.mubr.msk.f32.mxu0 %vm4567_vm1, %v4566_v22 }
0x1e9d   : > { %4141 = vmatprep.subr.mxu0 %v4566_v22 }
0x1e9e   : > { %4142 = vmatpush3.msra.mxu0 %v4880_v14 }
0x1e9f   : > { %4153 = vmatprep.subr.mxu0 %v2390_v3 }
0x1f5b   : > { %v2040_v62 = vpop.f32.mrf.mxu0 }
0x1f5c   : > { %v2044_v21 = vadd.f32 %v2040_v62, %v1554_v61 }
0x1f5d   : > { %v4131_v0 = vpop.f32.mrf.mxu0 }
0x1f5e   : > { %4416 = vtanh.f32 %v2044_v21  ;;  %v3770_v4 = vmul.f32 -1.442695, %v2044_v21 }
0x1f60   : > { %4418 = vpow2.f32 %v3770_v4 }
0x1f6b   : > { %v4417_v2 = vpop.eup %4416 }
0x1f6c   : > { %2054 = vrot.lane.b32.xlu0 %v4417_v2, %s4568_s25 }
0x1f6d   : > { %v4419_v47 = vpop.eup %4418 }
0x1f6e   : > { %v2048_v5 = vadd.f32 1.0, %v4419_v47 }
0x1f70   : > { %4420 = vrcp.f32 %v2048_v5 }
0x1f7d   : > { %v4421_v1 = vpop.eup %4420 }
0x1f7e   : > { %v2052_v8 = vmul.f32 %v4421_v1, %v1962_v54  ;;  %v1564_v54 = vadd.f32 %v4908_v31, %v4981_v60 }
0x1fde   : > { %v2055_v6 = vpop.permute.xlu0 %2054 }
0x1fdf   : > { %v2057_v7 = vmul.f32 %v4421_v1, %v2055_v6 }
0x1fe1   : > { %2059 = vrot.lane.b32.xlu1 %v2057_v7, %s4569_s28 }
0x2053   : > { %v2060_v9 = vpop.permute.xlu1 %2059 }
0x2054   : > { %v2062_v10 = vadd.f32 %v2060_v9, %v2052_v8 }
0x2056   : > { %4422 = vtanh.f32 %v2062_v10 }
0x2063   : > { %v4423_v11 = vpop.eup %4422 }
0x2064   : > { %2065 = vrot.lane.b32.xlu0 %v4423_v11, %s4570_s5 }
0x20d6   : > { %v2066_v12 = vpop.permute.xlu0 %2065 }
0x20d7   : > { %v2068_v15 = vmul.f32 %v4421_v1, %v2066_v12  ;;  %v2551_v1 = vld [vmem:[%s5416_s2 + $0x70] sm:$0x1f]  ;;  %v5055_v12 = vld [vmem:[%s5417_s3 + $0x3] ss:$0 sm:$0xff] }
0x20d9   : > { %2070 = vrot.lane.b32.xlu1 %v2068_v15, %s4571_s6 }
0x214b   : > { %v4988_v16 = vpop.permute.xlu1 %2070 }
0x214c   : > { %4137 = vmatmul.mubr.msk.f32.vlgmr.msra.gmra.mxu1 %vm365_vm0, %v4988_v16  ;;  %v2384_v18 = vsel %vm365_vm0, %v4988_v16, %v4500_v51 }
0x214d   : > { %4147 = vmatpush3.msra.mxu1 %v4874_v13  ;;  %4150 = vmatprep.mubr.msk.f32.mxu1 %vm4567_vm1, %v4566_v22 }
0x214e   : > { %4148 = vmatprep.subr.mxu1 %v4566_v22 }
0x214f   : > { %4149 = vmatpush3.msra.mxu1 %v4880_v14 }
0x2150   : > { %4171 = vmatprep.subr.msk.mxu1 %vm2582_vm11, %v2551_v1 }
0x220c   : > { %v2140_v19 = vpop.f32.mrf.mxu1 }
0x220d   : > { %v2144_v20 = vadd.f32 %v2140_v19, %v1559_v17 }
0x220e   : > { %v4138_v23 = vpop.f32.mrf.mxu1 }
0x220f   : > { %4424 = vtanh.f32 %v2144_v20  ;;  %v3772_v32 = vmul.f32 -1.442695, %v2144_v20 }
0x2211   : > { %4426 = vpow2.f32 %v3772_v32 }
0x221c   : > { %v4425_v24 = vpop.eup %4424 }
0x221d   : > { %2154 = vrot.lane.b32.xlu0 %v4425_v24, %s4568_s25 }
0x221e   : > { %v4427_v33 = vpop.eup %4426 }
0x221f   : > { %v2148_v13 = vadd.f32 1.0, %v4427_v33 }
0x2221   : > { %4428 = vrcp.f32 %v2148_v13 }
0x222e   : > { %v4429_v34 = vpop.eup %4428 }
0x222f   : > { %v2152_v22 = vmul.f32 %v4429_v34, %v2062_v10 }
0x228f   : > { %v2155_v35 = vpop.permute.xlu0 %2154 }
0x2290   : > { %v2157_v36 = vmul.f32 %v4429_v34, %v2155_v35 }
0x2292   : > { %2159 = vrot.lane.b32.xlu1 %v2157_v36, %s4569_s28 }
0x2304   : > { %v2160_v14 = vpop.permute.xlu1 %2159 }
0x2305   : > { %v2162_v30 = vadd.f32 %v2160_v14, %v2152_v22  ;;  %v4502_v22 = vld [vmem:[%s4690_s7 + $0x30] sm:$0xff] }
0x2307   : > { %4430 = vtanh.f32 %v2162_v30 }
0x2314   : > { %v4431_v27 = vpop.eup %4430 }
0x2315   : > { %2165 = vrot.lane.b32.xlu0 %v4431_v27, %s4570_s5 }
0x2387   : > { %v2166_v38 = vpop.permute.xlu0 %2165 }
0x2388   : > { %v2168_v39 = vmul.f32 %v4429_v34, %v2166_v38  ;;  %v2550_v34 = vld [vmem:[%s5416_s2 + $0x68] sm:$0xff] }
0x238a   : > { %2170 = vrot.lane.b32.xlu1 %v2168_v39, %s4571_s6 }
0x23fc   : > { %v5005_v40 = vpop.permute.xlu1 %2170 }
0x23fd   : > { %4144 = vmatmul.mubr.msk.f32.vlgmr.msra.gmra.mxu0 %vm365_vm0, %v5005_v40  ;;  %v2385_v53 = vsel %vm365_vm0, %v5005_v40, %v4501_v52 }
0x23fe   : > { %4154 = vmatpush3.msra.mxu0 %v2390_v3  ;;  %4159 = vmatprep.mubr.msk.f32.mxu0 %vm2396_vm10, %v2380_v28 }
0x23ff   : > { %4155 = vmatprep.subr.mxu0 %v2389_v41 }
0x2400   : > { %4156 = vmatpush3.msra.mxu0 %v2389_v41 }
0x2401   : > { %4157 = vmatprep.subr.mxu0 %v2388_v42 }
0x2402   : > { %4158 = vmatpush3.msra.mxu0 %v2388_v42 }
0x2403   : > { %4160 = vmatmul.mubr.msk.f32.vlgmr.msra.gmra.mxu0 %vm2396_vm10, %v2381_v44  ;;  %v1569_v44 = vadd.f32 %v4979_v59, %v4908_v31 }
0x2404   : > { %4162 = vmatprep.mubr.msk.f32.mxu0 %vm2396_vm10, %v2382_v46 }
0x2407   : > { %4163 = vmatmul.mubr.msk.f32.gmra.mxu0 %vm2396_vm10, %v2383_v50 }
0x2408   : > { %4165 = vmatprep.mubr.msk.f32.mxu0 %vm2396_vm10, %v2384_v18 }
0x240b   : > { %4166 = vmatmul.mubr.msk.f32.gmra.mxu0 %vm2396_vm10, %v2385_v53 }
0x24bd   : > { %v2240_v55 = vpop.f32.mrf.mxu0 }
0x24be   : > { %v2244_v29 = vadd.f32 %v2240_v55, %v1564_v54 }
0x24bf   : > { %v4145_v56 = vpop.f32.mrf.mxu0 }
0x24c0   : > { %4432 = vtanh.f32 %v2244_v29  ;;  %v3774_v58 = vmul.f32 -1.442695, %v2244_v29 }
0x24c2   : > { %4434 = vpow2.f32 %v3774_v58 }
0x24c3   : > { %v4161_v8 = vpop.f32.mrf.mxu0 }
0x24c4   : > { %v2493_v19 = vadd.f32 %v4161_v8, %v5055_v12 }
0x24c5   : > { %v2487_v9 = vpop.f32.mrf.mxu0 }
0x24c6   : > { %v2488_v15 = vadd.f32 %v5055_v12, %v2487_v9  ;;  %v2535_v32 = vmul.f32 0.01, %v2493_v19  ;;  %vm2527_vm14 = vcmp.gt.f32.partialorder %v2493_v19, 0.0 }
0x24c7   : > { %v4164_v10 = vpop.f32.mrf.mxu0 }
0x24c8   : > { %v2534_v23 = vmul.f32 0.01, %v2488_v15  ;;  %vm2526_vm12 = vcmp.gt.f32.partialorder %v2488_v15, 0.0  ;;  %v2503_v33 = vadd.f32 %v4164_v10, %v5055_v12  ;;  %v2543_v3 = vsel %vm2527_vm14, %v2493_v19, %v2535_v32 }
0x24c9   : > { %v2497_v11 = vpop.f32.mrf.mxu0 }
0x24ca   : > { %v2498_v20 = vadd.f32 %v5055_v12, %v2497_v11  ;;  %v2537_v27 = vmul.f32 0.01, %v2503_v33  ;;  %vm2529_vm1 = vcmp.gt.f32.partialorder %v2503_v33, 0.0  ;;  %v3786_v11 = vld [vmem:[%s5417_s3 + $0x4] ss:$0 sm:$0xff] }
0x24cb   : > { %v4167_v17 = vpop.f32.mrf.mxu0 }
0x24cc   : > { %v2536_v35 = vmul.f32 0.01, %v2498_v20  ;;  %vm2528_vm15 = vcmp.gt.f32.partialorder %v2498_v20, 0.0  ;;  %v2513_v38 = vadd.f32 %v4167_v17, %v5055_v12  ;;  %v2545_v28 = vsel %vm2529_vm1, %v2503_v33, %v2537_v27 }
0x24cd   : > { %v4433_v25 = vpop.eup %4432  ;;  %v2507_v24 = vpop.f32.mrf.mxu0 }
0x24ce   : > { %2254 = vrot.lane.b32.xlu0 %v4433_v25, %s4568_s25  ;;  %v2508_v36 = vadd.f32 %v5055_v12, %v2507_v24  ;;  %v2544_v41 = vsel %vm2528_vm15, %v2498_v20, %v2536_v35  ;;  %v2539_v26 = vmul.f32 0.01, %v2513_v38  ;;  %vm2531_vm3 = vcmp.gt.f32.partialorder %v2513_v38, 0.0 }
0x24cf   : > { %v4435_v61 = vpop.eup %4434 }
0x24d0   : > { %v2248_v62 = vadd.f32 1.0, %v4435_v61  ;;  %v2538_v39 = vmul.f32 0.01, %v2508_v36  ;;  %vm2530_vm2 = vcmp.gt.f32.partialorder %v2508_v36, 0.0  ;;  %v2547_v43 = vsel %vm2531_vm3, %v2513_v38, %v2539_v26 }
0x24d2   : > { %4436 = vrcp.f32 %v2248_v62  ;;  %v2546_v42 = vsel %vm2530_vm2, %v2508_v36, %v2538_v39  ;;  %v4503_v62 = vld [vmem:[%s4690_s7 + $0x38] sm:$0xff]  ;;  %s5103_s7 = scalar_lea.vmem [#allocation3], %s4682_s30  ;;  %s3623_s30 = sshll.u32 %s5318_s13, 4  ;;  %s5356_s30 = int_to_ptr.vmem [resolvable:$true] %s3623_s30 }
0x24d3   : > { %s4504_s8 = scalar_lea.vmem %s5356_s30, 1024 }
0x24d4   : > { %p4505_p13 = scmp.ne.s32.totalorder %s5356_s30, %s4504_s8 }
0x24d6   : > { %p4506_p0 = pnand %p4505_p13, %p4646_p6 }
0x24d8   : > { %p4507_p1 = pneg %p4506_p0 }
0x24df   : > { %v4437_v21 = vpop.eup %4436 }
0x24e0   : > { %v2252_v4 = vmul.f32 %v4437_v21, %v2162_v30  ;;  %v2542_v30 = vsel %vm2526_vm12, %v2488_v15, %v2534_v23 }
0x2540   : > { %v2255_v0 = vpop.permute.xlu0 %2254 }
0x2541   : > { %v2257_v2 = vmul.f32 %v4437_v21, %v2255_v0  ;;  %v2716_v0 = vld [vmem:[%s5416_s2 + $0x80] sm:$0x1f] }
0x2543   : > { %2259 = vrot.lane.b32.xlu1 %v2257_v2, %s4569_s28  ;;  %v2715_v2 = vld [vmem:[%s5416_s2 + $0x78] sm:$0xff] }
0x25b5   : > { %v2260_v47 = vpop.permute.xlu1 %2259 }
0x25b6   : > { %v5043_v60 = vadd.f32 %v2260_v47, %v2252_v4  ;;  %v351_v4 = vld [vmem:[%s5103_s7 + $0x8] sm:$0xff]  ;;  %v350_v47 = vld [vmem:[%s5103_s7] sm:$0xff] }
0x25b8   : > { %4438 = vtanh.f32 %v5043_v60 }
0x25c5   : > { %v4439_v5 = vpop.eup %4438 }
0x25c6   : > { %2265 = vrot.lane.b32.xlu0 %v4439_v5, %s4570_s5  ;;  %v352_v5 = vld [vmem:[%s5103_s7 + $0x10] sm:$0xff] }
0x2638   : > { %v2266_v6 = vpop.permute.xlu0 %2265 }
0x2639   : > { %v2268_v7 = vmul.f32 %v4437_v21, %v2266_v6  ;;  %v354_v6 = vld [vmem:[%s5103_s7 + $0x20] sm:$0xff] }
0x263b   : > { %2270 = vrot.lane.b32.xlu1 %v2268_v7, %s4571_s6 }
0x26ad   : > { %v5061_v13 = vpop.permute.xlu1 %2270 }
0x26ae   : > { %4151 = vmatmul.mubr.msk.f32.vlgmr.msra.gmra.mxu1 %vm365_vm0, %v5061_v13  ;;  %v2386_v14 = vsel %vm365_vm0, %v5061_v13, %v4502_v22 }
0x26af   : > { %4168 = vmatprep.mubr.msk.f32.mxu0 %vm2396_vm10, %v2386_v14  ;;  %4172 = vmatpush3.msk.msra.mxu1 %vm2582_vm11, %v2551_v1  ;;  %v355_v1 = vld [vmem:[%s5103_s7 + $0x28] sm:$0xff] }
0x26b0   : > { %4175 = vmatprep.mubr.msk.f32.mxu1 %vm2557_vm13, %v2542_v30  ;;  %4173 = vmatprep.subr.mxu1 %v2550_v34 }
0x26b1   : > { %4174 = vmatpush3.msra.mxu1 %v2550_v34 }
0x26b2   : > { %4176 = vmatmul.mubr.msk.f32.vlgmr.msra.gmra.mxu1 %vm2557_vm13, %v2543_v3  ;;  %4187 = vmatprep.subr.msk.mxu1 %vm2582_vm11, %v2716_v0 }
0x26b3   : > { %4178 = vmatprep.mubr.msk.f32.mxu1 %vm2557_vm13, %v2544_v41  ;;  %4188 = vmatpush3.msk.msra.mxu1 %vm2582_vm11, %v2716_v0 }
0x26b4   : > { %4189 = vmatprep.subr.mxu1 %v2715_v2 }
0x26b5   : > { %4190 = vmatpush3.msra.mxu1 %v2715_v2 }
0x26b6   : > { %4179 = vmatmul.mubr.msk.f32.gmra.mxu1 %vm2557_vm13, %v2545_v28 }
0x26b7   : > { %4181 = vmatprep.mubr.msk.f32.mxu1 %vm2557_vm13, %v2546_v42 }
0x26ba   : > { %4182 = vmatmul.mubr.msk.f32.gmra.mxu1 %vm2557_vm13, %v2547_v43 }
0x276e   : > { %v2340_v45 = vpop.f32.mrf.mxu1 }
0x276f   : > { %v2344_v46 = vadd.f32 %v2340_v45, %v1569_v44 }
0x2770   : > { %v4152_v49 = vpop.f32.mrf.mxu1 }
0x2771   : > { %4440 = vtanh.f32 %v2344_v46  ;;  %v3776_v51 = vmul.f32 -1.442695, %v2344_v46 }
0x2772   : > { %v4177_v7 = vpop.f32.mrf.mxu1 }
0x2773   : > { %4442 = vpow2.f32 %v3776_v51  ;;  %v2658_v32 = vadd.f32 %v4177_v7, %v3786_v11  ;;  %v356_v51 = vld [vmem:[%s5103_s7 + $0x30] sm:$0xff] }
0x2774   : > { %v2652_v8 = vpop.f32.mrf.mxu1 }
0x2775   : > { %v2653_v15 = vadd.f32 %v3786_v11, %v2652_v8  ;;  %v2700_v30 = vmul.f32 0.01, %v2658_v32  ;;  %vm2692_vm7 = vcmp.gt.f32.partialorder %v2658_v32, 0.0 }
0x2776   : > { %v4180_v9 = vpop.f32.mrf.mxu1 }
0x2777   : > { %v2699_v33 = vmul.f32 0.01, %v2653_v15  ;;  %vm2691_vm6 = vcmp.gt.f32.partialorder %v2653_v15, 0.0  ;;  %v2668_v3 = vadd.f32 %v4180_v9, %v3786_v11  ;;  %v2708_v41 = vsel %vm2692_vm7, %v2658_v32, %v2700_v30 }
0x2778   : > { %v2662_v10 = vpop.f32.mrf.mxu1 }
0x2779   : > { %v2663_v35 = vadd.f32 %v3786_v11, %v2662_v10  ;;  %v2702_v26 = vmul.f32 0.01, %v2668_v3  ;;  %vm2694_vm9 = vcmp.gt.f32.partialorder %v2668_v3, 0.0 }
0x277a   : > { %v4183_v20 = vpop.f32.mrf.mxu1 }
0x277b   : > { %v2701_v38 = vmul.f32 0.01, %v2663_v35  ;;  %vm2693_vm8 = vcmp.gt.f32.partialorder %v2663_v35, 0.0  ;;  %v2678_v28 = vadd.f32 %v4183_v20, %v3786_v11  ;;  %v2710_v45 = vsel %vm2694_vm9, %v2668_v3, %v2702_v26 }
0x277c   : > { %v2672_v22 = vpop.f32.mrf.mxu1 }
0x277d   : > { %v2673_v39 = vadd.f32 %v3786_v11, %v2672_v22  ;;  %v2709_v43 = vsel %vm2693_vm8, %v2663_v35, %v2701_v38  ;;  %v2704_v44 = vmul.f32 0.01, %v2678_v28  ;;  %vm2696_vm12 = vcmp.gt.f32.partialorder %v2678_v28, 0.0 }
0x277e   : > { %v4441_v50 = vpop.eup %4440 }
0x277f   : > { %2354 = vrot.lane.b32.xlu0 %v4441_v50, %s4568_s25  ;;  %v2703_v42 = vmul.f32 0.01, %v2673_v39  ;;  %vm2695_vm11 = vcmp.gt.f32.partialorder %v2673_v39, 0.0  ;;  %v2712_v49 = vsel %vm2696_vm12, %v2678_v28, %v2704_v44  ;;  %v357_v50 = vld [vmem:[%s5103_s7 + $0x38] sm:$0xff]  ;;  %s4508_s25 = sshll.u32 %s4576_s9, 4  ;;  %s4509_s25 = int_to_ptr.vmem [resolvable:$false] %s4508_s25 }
0x2780   : > { %v4443_v18 = vpop.eup %4442  ;;  %s4510_s10 = scalar_lea.vmem %s4509_s25, 2048  ;;  %p4511_p2 = scmp.lt.s32.totalorder %s5356_s30, %s4509_s25 }
0x2781   : > { %v2348_v52 = vadd.f32 1.0, %v4443_v18  ;;  %v2711_v46 = vsel %vm2695_vm11, %v2673_v39, %v2703_v42  ;;  %p4512_p3 = scmp.lt.s32.totalorder %s4510_s10, %s4504_s8 }
0x2783   : > { %4444 = vrcp.f32 %v2348_v52  ;;  %p4513_p4 = por %p4512_p3, %p4511_p2 }
0x2785   : > { %p4514_p5 = pnand %p4513_p4, %p4507_p1 }
0x2790   : > { %v4445_v53 = vpop.eup %4444 }
0x2791   : > { %v2352_v31 = vmul.f32 %v4445_v53, %v5043_v60  ;;  %v353_v60 = vld [vmem:[%s5103_s7 + $0x18] sm:$0xff] }
0x27f1   : > { %v2355_v54 = vpop.permute.xlu0 %2354 }
0x27f2   : > { %v2357_v55 = vmul.f32 %v4445_v53, %v2355_v54  ;;  %v5137_v54 = vld [vmem:[%s5417_s3 + $0x5] ss:$0 sm:$0xff] }
0x27f4   : > { %2359 = vrot.lane.b32.xlu1 %v2357_v55, %s4569_s28 }
0x2866   : > { %v2360_v59 = vpop.permute.xlu1 %2359 }
0x2867   : > { %v2362_v29 = vadd.f32 %v2360_v59, %v2352_v31 }
0x2869   : > { %4446 = vtanh.f32 %v2362_v29 }
0x2876   : > { %v4447_v56 = vpop.eup %4446 }
0x2877   : > { %2365 = vrot.lane.b32.xlu0 %v4447_v56, %s4570_s5  ;;  %s4574_s5 = smov 24  }
0x28e9   : > { %v2366_v25 = vpop.permute.xlu0 %2365 }
0x28ea   : > { %v2368_v58 = vmul.f32 %v4445_v53, %v2366_v25 }
0x28ec   : > { %2370 = vrot.lane.b32.xlu1 %v2368_v58, %s4571_s6  ;;  %s4572_s6 = smov 8  }
0x28ed   : > { %2886 = vrot.lane.b32.xlu0 %v350_v47, %s4572_s6 }
0x28f0   : > { %2888 = vrot.lane.b32.xlu1 %v351_v4, %s4572_s6 }
0x28f1   : > { %2890 = vrot.lane.b32.xlu0 %v352_v5, %s4572_s6 }
0x28f4   : > { %2892 = vrot.lane.b32.xlu1 %v353_v60, %s4572_s6 }
0x28f5   : > { %2894 = vrot.lane.b32.xlu0 %v354_v6, %s4572_s6 }
0x28f8   : > { %2896 = vrot.lane.b32.xlu1 %v355_v1, %s4572_s6 }
0x28f9   : > { %2898 = vrot.lane.b32.xlu0 %v356_v51, %s4572_s6 }
0x28fc   : > { %2900 = vrot.lane.b32.xlu1 %v357_v50, %s4572_s6 }
0x295e   : > { %v5088_v61 = vpop.permute.xlu1 %2370 }
0x295f   : > { %v2387_v21 = vsel %vm365_vm0, %v5088_v61, %v4503_v62 }
0x2960   : > { %4169 = vmatmul.mubr.msk.f32.gmra.mxu0 %vm2396_vm10, %v2387_v21 }
0x2962   : > { %v2889_v32 = vpop.permute.xlu1 %2888 }
0x2a20   : > { %v4170_v17 = vpop.f32.mrf.mxu0 }
0x2a21   : > { %v2523_v19 = vadd.f32 %v4170_v17, %v5055_v12 }
0x2a22   : > { %v2517_v23 = vpop.f32.mrf.mxu0 }
0x2a23   : > { %v2518_v24 = vadd.f32 %v5055_v12, %v2517_v23  ;;  %v2541_v34 = vmul.f32 0.01, %v2523_v19  ;;  %vm2533_vm4 = vcmp.gt.f32.partialorder %v2523_v19, 0.0  ;;  %v2707_v12 = vsel %vm2691_vm6, %v2653_v15, %v2699_v33 }
0x2a25   : > { %vm2532_vm5 = vcmp.gt.f32.partialorder %v2518_v24, 0.0  ;;  %v2540_v36 = vmul.f32 0.01, %v2518_v24  ;;  %v2549_v27 = vsel %vm2533_vm4, %v2523_v19, %v2541_v34  ;;  %v2887_v34 = vpop.permute.xlu0 %2886 }
0x2a27   : > { %v2548_v14 = vsel %vm2532_vm5, %v2518_v24, %v2540_v36  ;;  %v2893_v36 = vpop.permute.xlu1 %2892 }
0x2a28   : > { %4184 = vmatprep.mubr.msk.f32.mxu1 %vm2557_vm13, %v2548_v14 }
0x2a29   : > { %4185 = vmatmul.mubr.msk.f32.gmra.mxu1 %vm2557_vm13, %v2549_v27  ;;  %v2891_v30 = vpop.permute.xlu0 %2890 }
0x2a2a   : > { %4191 = vmatprep.mubr.msk.f32.mxu1 %vm2557_vm13, %v2707_v12 }
0x2a2b   : > { %v2897_v12 = vpop.permute.xlu1 %2896 }
0x2a2d   : > { %4192 = vmatmul.mubr.msk.f32.vlgmr.msra.gmra.mxu1 %vm2557_vm13, %v2708_v41  ;;  %v2895_v28 = vpop.permute.xlu0 %2894 }
0x2a2e   : > { %4194 = vmatprep.mubr.msk.f32.mxu1 %vm2557_vm13, %v2709_v43 }
0x2a31   : > { %4195 = vmatmul.mubr.msk.f32.gmra.mxu1 %vm2557_vm13, %v2710_v45 }
0x2a32   : > { %4197 = vmatprep.mubr.msk.f32.mxu1 %vm2557_vm13, %v2711_v46 }
0x2a35   : > { %4198 = vmatmul.mubr.msk.f32.gmra.mxu1 %vm2557_vm13, %v2712_v49 }
0x2ae9   : > { %v4186_v18 = vpop.f32.mrf.mxu1 }
0x2aea   : > { %v2688_v52 = vadd.f32 %v4186_v18, %v3786_v11 }
0x2aeb   : > { %v2682_v53 = vpop.f32.mrf.mxu1 }
0x2aec   : > { %v2683_v55 = vadd.f32 %v3786_v11, %v2682_v53  ;;  %v2706_v31 = vmul.f32 0.01, %v2688_v52  ;;  %vm2698_vm14 = vcmp.gt.f32.partialorder %v2688_v52, 0.0 }
0x2aed   : > { %v4193_v59 = vpop.f32.mrf.mxu1 }
0x2aee   : > { %vm2697_vm15 = vcmp.gt.f32.partialorder %v2683_v55, 0.0  ;;  %v2705_v29 = vmul.f32 0.01, %v2683_v55  ;;  %v5140_v56 = vadd.f32 %v4193_v59, %v5137_v54  ;;  %v2714_v2 = vsel %vm2698_vm14, %v2688_v52, %v2706_v31  ;;  %v3000_v31 = vld [vmem:[%s5416_s2 + $0x98] sm:$0xff]  ;;  %v2899_v59 = vpop.permute.xlu0 %2898 }
0x2aef   : > { %v2815_v25 = vpop.f32.mrf.mxu1  ;;  %4203 = vmatprep.subr.mxu0 %v3000_v31 }
0x2af0   : > { %v2855_v58 = vmul.f32 0.5, %v5140_v56  ;;  %v5144_v62 = vadd.f32 %v5137_v54, %v2815_v25  ;;  %v2713_v21 = vsel %vm2697_vm15, %v2683_v55, %v2705_v29  ;;  %v2901_v55 = vpop.permute.xlu1 %2900  ;;  %4204 = vmatpush3.msra.mxu0 %v3000_v31  ;;  %v2999_v29 = vld [vmem:[%s5416_s2 + $0x90] sm:$0xff] }
0x2af1   : > { %v4196_v0 = vpop.f32.mrf.mxu1  ;;  %4200 = vmatprep.mubr.msk.f32.mxu1 %vm2557_vm13, %v2713_v21  ;;  %4205 = vmatprep.subr.mxu0 %v2999_v29 }
0x2af2   : > { %v2864_v4 = vmul.f32 1.442695, %v2855_v58  ;;  %v2854_v47 = vmul.f32 0.5, %v5144_v62  ;;  %v5149_v60 = vadd.f32 %v4196_v0, %v5137_v54  ;;  %4201 = vmatmul.mubr.msk.f32.gmra.mxu1 %vm2557_vm13, %v2714_v2  ;;  %4206 = vmatpush3.msra.mxu0 %v2999_v29 }
0x2af3   : > { %v2825_v5 = vpop.f32.mrf.mxu1 }
0x2af4   : > { %4448 = vpow2.f32 %v2864_v4  ;;  %v2862_v1 = vmul.f32 1.442695, %v2854_v47  ;;  %v2857_v6 = vmul.f32 0.5, %v5149_v60  ;;  %v5154_v7 = vadd.f32 %v5137_v54, %v2825_v5 }
0x2af5   : > { %v4199_v8 = vpop.f32.mrf.mxu1 }
0x2af6   : > { %4450 = vpow2.f32 %v2862_v1  ;;  %v2868_v9 = vmul.f32 1.442695, %v2857_v6  ;;  %v2856_v10 = vmul.f32 0.5, %v5154_v7  ;;  %v5158_v11 = vadd.f32 %v4199_v8, %v5137_v54 }
0x2af7   : > { %v2835_v15 = vpop.f32.mrf.mxu1 }
0x2af8   : > { %4452 = vpow2.f32 %v2868_v9  ;;  %v2866_v17 = vmul.f32 1.442695, %v2856_v10  ;;  %v2859_v19 = vmul.f32 0.5, %v5158_v11  ;;  %v5162_v20 = vadd.f32 %v5137_v54, %v2835_v15 }
0x2afa   : > { %4454 = vpow2.f32 %v2866_v17  ;;  %v2872_v23 = vmul.f32 1.442695, %v2859_v19  ;;  %v2858_v24 = vmul.f32 0.5, %v5162_v20 }
0x2afc   : > { %4456 = vpow2.f32 %v2872_v23  ;;  %v2870_v33 = vmul.f32 1.442695, %v2858_v24 }
0x2afe   : > { %4458 = vpow2.f32 %v2870_v33 }
0x2b01   : > { %v4449_v35 = vpop.eup %4448 }
0x2b02   : > { %v2911_v22 = vmul.f32 %v4449_v35, %v2889_v32 }
0x2b03   : > { %v4451_v14 = vpop.eup %4450 }
0x2b04   : > { %v2910_v3 = vmul.f32 %v4451_v14, %v2887_v34  ;;  %2928 = vrot.lane.b32.xlu1 %v2911_v22, %s4573_s22 }
0x2b05   : > { %v4453_v27 = vpop.eup %4452 }
0x2b06   : > { %v2913_v38 = vmul.f32 %v4453_v27, %v2893_v36  ;;  %2926 = vrot.lane.b32.xlu0 %v2910_v3, %s4573_s22 }
0x2b07   : > { %v4455_v39 = vpop.eup %4454 }
0x2b08   : > { %v2912_v41 = vmul.f32 %v4455_v39, %v2891_v30  ;;  %2932 = vrot.lane.b32.xlu1 %v2913_v38, %s4573_s22 }
0x2b09   : > { %v4457_v26 = vpop.eup %4456 }
0x2b0a   : > { %v2915_v42 = vmul.f32 %v4457_v26, %v2897_v12  ;;  %2930 = vrot.lane.b32.xlu0 %v2912_v41, %s4573_s22  ;;  %v3329_v12 = vld [vmem:[%s5416_s2 + $0xf8] sm:$0xff]  ;;  %v3328_v41 = vld [vmem:[%s5416_s2 + $0xf0] sm:$0xff] }
0x2b0b   : > { %v4459_v43 = vpop.eup %4458 }
0x2b0c   : > { %v2914_v44 = vmul.f32 %v4459_v43, %v2895_v28  ;;  %2936 = vrot.lane.b32.xlu1 %v2915_v42, %s4573_s22 }
0x2b0e   : > { %2934 = vrot.lane.b32.xlu0 %v2914_v44, %s4573_s22 }
0x2b76   : > { %v2929_v25 = vpop.permute.xlu1 %2928 }
0x2b77   : > { %v2951_v5 = vadd.f32 %v2929_v25, %v5140_v56 }
0x2b78   : > { %v2927_v21 = vpop.permute.xlu0 %2926 }
0x2b79   : > { %v2950_v6 = vadd.f32 %v2927_v21, %v5144_v62 }
0x2b7a   : > { %v2933_v47 = vpop.permute.xlu1 %2932 }
0x2b7b   : > { %v2953_v8 = vadd.f32 %v2933_v47, %v5149_v60  ;;  %v3326_v47 = vld [vmem:[%s5416_s2 + $0xe0] sm:$0xff] }
0x2b7c   : > { %v2931_v1 = vpop.permute.xlu0 %2930 }
0x2b7d   : > { %v2952_v10 = vadd.f32 %v2931_v1, %v5154_v7  ;;  %v3324_v1 = vld [vmem:[%s5416_s2 + $0xd0] sm:$0xff] }
0x2b7e   : > { %v2937_v9 = vpop.permute.xlu1 %2936 }
0x2b7f   : > { %v2955_v17 = vadd.f32 %v2937_v9, %v5158_v11 }
0x2b80   : > { %v2935_v15 = vpop.permute.xlu0 %2934 }
0x2b81   : > { %v2954_v19 = vadd.f32 %v2935_v15, %v5162_v20 }
0x2bb2   : > { %v4202_v45 = vpop.f32.mrf.mxu1 }
0x2bb3   : > { %v5172_v46 = vadd.f32 %v4202_v45, %v5137_v54 }
0x2bb4   : > { %v2845_v49 = vpop.f32.mrf.mxu1 }
0x2bb5   : > { %v2861_v50 = vmul.f32 0.5, %v5172_v46  ;;  %v5176_v51 = vadd.f32 %v5137_v54, %v2845_v49  ;;  %v2998_v54 = vld [vmem:[%s5416_s2 + $0x88] sm:$0xff] }
0x2bb6   : > { %4207 = vmatprep.subr.mxu0 %v2998_v54 }
0x2bb7   : > { %v2876_v18 = vmul.f32 1.442695, %v2861_v50  ;;  %v2860_v52 = vmul.f32 0.5, %v5176_v51  ;;  %4208 = vmatpush3.msra.mxu0 %v2998_v54 }
0x2bb8   : > { %4245 = vmatprep.subr.mxu0 %v3329_v12 }
0x2bb9   : > { %4460 = vpow2.f32 %v2876_v18  ;;  %v2874_v53 = vmul.f32 1.442695, %v2860_v52 }
0x2bbb   : > { %4462 = vpow2.f32 %v2874_v53 }
0x2bc6   : > { %v4461_v58 = vpop.eup %4460 }
0x2bc7   : > { %v2917_v0 = vmul.f32 %v4461_v58, %v2901_v55 }
0x2bc8   : > { %v4463_v2 = vpop.eup %4462 }
0x2bc9   : > { %2940 = vrot.lane.b32.xlu1 %v2917_v0, %s4573_s22  ;;  %v2916_v4 = vmul.f32 %v4463_v2, %v2899_v59 }
0x2bcb   : > { %2938 = vrot.lane.b32.xlu0 %v2916_v4, %s4573_s22  ;;  %v3327_v4 = vld [vmem:[%s5416_s2 + $0xe8] sm:$0xff]  ;;  %s5366_s22 = scalar_lea.hbm %s5418_s4, %s3842_s14 }
0x2bcd   : > { %2968 = vrot.lane.b32.xlu1 %v2951_v5, %s4569_s28 }
0x2bcf   : > { %2966 = vrot.lane.b32.xlu0 %v2950_v6, %s4569_s28 }
0x2bd1   : > { %2972 = vrot.lane.b32.xlu1 %v2953_v8, %s4569_s28 }
0x2bd3   : > { %2970 = vrot.lane.b32.xlu0 %v2952_v10, %s4569_s28 }
0x2bd5   : > { %2976 = vrot.lane.b32.xlu1 %v2955_v17, %s4569_s28 }
0x2bd7   : > { %2974 = vrot.lane.b32.xlu0 %v2954_v19, %s4569_s28 }
0x2c3b   : > { %v2941_v23 = vpop.permute.xlu1 %2940 }
0x2c3c   : > { %v2957_v24 = vadd.f32 %v2941_v23, %v5172_v46 }
0x2c3d   : > { %v2939_v32 = vpop.permute.xlu0 %2938 }
0x2c3e   : > { %v2956_v33 = vadd.f32 %v2939_v32, %v5176_v51  ;;  %2980 = vrot.lane.b32.xlu1 %v2957_v24, %s4569_s28 }
0x2c3f   : > { %v2969_v34 = vpop.permute.xlu1 %2968 }
0x2c40   : > { %2978 = vrot.lane.b32.xlu0 %v2956_v33, %s4569_s28  ;;  %v2991_v22 = vsel %vm365_vm0, %v4930_v63, %v2969_v34  ;;  %s4575_s28 = smov 40  }
0x2c41   : > { %v2967_v35 = vpop.permute.xlu0 %2966 }
0x2c42   : > { %v2990_v36 = vsel %vm365_vm0, %v4915_v48, %v2967_v35  ;;  %3522 = vrot.lane.b32.xlu1 %v5140_v56, %s4574_s5 }
0x2c43   : > { %v2973_v14 = vpop.permute.xlu1 %2972  ;;  %4209 = vmatprep.mubr.msk.f32.mxu0 %vm2396_vm10, %v2990_v36 }
0x2c44   : > { %3520 = vrot.lane.b32.xlu0 %v5144_v62, %s4574_s5  ;;  %4210 = vmatmul.mubr.msk.f32.vlgmr.msra.gmra.mxu0 %vm2396_vm10, %v2991_v22  ;;  %v2993_v48 = vsel %vm365_vm0, %v4970_v57, %v2973_v14  ;;  %v3164_v57 = vld [vmem:[%s5416_s2 + $0xc8] sm:$0xff] }
0x2c45   : > { %v2971_v30 = vpop.permute.xlu0 %2970  ;;  %4221 = vmatprep.subr.mxu1 %v3164_v57  ;;  %4246 = vmatpush3.msra.mxu0 %v3329_v12 }
0x2c46   : > { %v2992_v3 = vsel %vm365_vm0, %v4949_v37, %v2971_v30  ;;  %3526 = vrot.lane.b32.xlu1 %v5149_v60, %s4574_s5  ;;  %4222 = vmatpush3.msra.mxu1 %v3164_v57  ;;  %v3161_v60 = vld [vmem:[%s5416_s2 + $0xb0] sm:$0xff] }
0x2c47   : > { %4212 = vmatprep.mubr.msk.f32.mxu0 %vm2396_vm10, %v2992_v3  ;;  %v2977_v56 = vpop.permute.xlu1 %2976  ;;  %4247 = vmatprep.subr.mxu0 %v3328_v41 }
0x2c48   : > { %3524 = vrot.lane.b32.xlu0 %v5154_v7, %s4574_s5  ;;  %4213 = vmatmul.mubr.msk.f32.gmra.mxu0 %vm2396_vm10, %v2993_v48  ;;  %v2995_v37 = vsel %vm365_vm0, %v5005_v40, %v2977_v56  ;;  %v3162_v40 = vld [vmem:[%s5416_s2 + $0xb8] sm:$0xff]  ;;  %v3160_v7 = vld [vmem:[%s5416_s2 + $0xa8] sm:$0xff] }
0x2c49   : > { %v2975_v63 = vpop.permute.xlu0 %2974  ;;  %4248 = vmatpush3.msra.mxu0 %v3328_v41 }
0x2c4a   : > { %v2994_v62 = vsel %vm365_vm0, %v4988_v16, %v2975_v63  ;;  %3530 = vrot.lane.b32.xlu1 %v5158_v11, %s4574_s5  ;;  %v3163_v16 = vld [vmem:[%s5416_s2 + $0xc0] sm:$0xff]  ;;  %4249 = vmatprep.subr.mxu0 %v3327_v4 }
0x2c4b   : > { %4215 = vmatprep.mubr.msk.f32.mxu0 %vm2396_vm10, %v2994_v62  ;;  %4223 = vmatprep.subr.mxu1 %v3163_v16  ;;  %v3159_v11 = vld [vmem:[%s5416_s2 + $0xa0] sm:$0xff] }
0x2c4c   : > { %3528 = vrot.lane.b32.xlu0 %v5162_v20, %s4574_s5  ;;  %4216 = vmatmul.mubr.msk.f32.gmra.mxu0 %vm2396_vm10, %v2995_v37 }
0x2c4d   : > { %4224 = vmatpush3.msra.mxu1 %v3163_v16  ;;  %4250 = vmatpush3.msra.mxu0 %v3327_v4 }
0x2c4e   : > { %3534 = vrot.lane.b32.xlu1 %v5172_v46, %s4574_s5  ;;  %4225 = vmatprep.subr.mxu1 %v3162_v40 }
0x2c4f   : > { %4226 = vmatpush3.msra.mxu1 %v3162_v40  ;;  %4251 = vmatprep.subr.mxu0 %v3326_v47 }
0x2c50   : > { %3532 = vrot.lane.b32.xlu0 %v5176_v51, %s4574_s5  ;;  %4227 = vmatprep.subr.mxu1 %v3161_v60 }
0x2c51   : > { %4228 = vmatpush3.msra.mxu1 %v3161_v60  ;;  %4252 = vmatpush3.msra.mxu0 %v3326_v47 }
0x2c52   : > { %3546 = vrot.lane.b32.xlu1 %v2951_v5, %s4575_s28  ;;  %4229 = vmatprep.subr.mxu1 %v3160_v7  ;;  %v3325_v5 = vld [vmem:[%s5416_s2 + $0xd8] sm:$0xff] }
0x2c53   : > { %4230 = vmatpush3.msra.mxu1 %v3160_v7  ;;  %4253 = vmatprep.subr.mxu0 %v3325_v5 }
0x2c54   : > { %3544 = vrot.lane.b32.xlu0 %v2950_v6, %s4575_s28  ;;  %4231 = vmatprep.subr.mxu1 %v3159_v11 }
0x2c55   : > { %4232 = vmatpush3.msra.mxu1 %v3159_v11  ;;  %4254 = vmatpush3.msra.mxu0 %v3325_v5 }
0x2c56   : > { %3550 = vrot.lane.b32.xlu1 %v2953_v8, %s4575_s28  ;;  %4255 = vmatprep.subr.mxu0 %v3324_v1 }
0x2c57   : > { %4256 = vmatpush3.msra.mxu0 %v3324_v1 }
0x2c58   : > { %3548 = vrot.lane.b32.xlu0 %v2952_v10, %s4575_s28 }
0x2c5a   : > { %3554 = vrot.lane.b32.xlu1 %v2955_v17, %s4575_s28 }
0x2c5c   : > { %3552 = vrot.lane.b32.xlu0 %v2954_v19, %s4575_s28 }
0x2c5e   : > { %3558 = vrot.lane.b32.xlu1 %v2957_v24, %s4575_s28  ;;  %v3815_v24 = vld [vmem:[%s5417_s3 + $0x7] ss:$0 sm:$0xff] }
0x2c60   : > { %3556 = vrot.lane.b32.xlu0 %v2956_v33, %s4575_s28 }
0x2cb0   : > { %v2981_v20 = vpop.permute.xlu1 %2980 }
0x2cb1   : > { %v2997_v39 = vsel %vm365_vm0, %v5088_v61, %v2981_v20 }
0x2cb2   : > { %v2979_v27 = vpop.permute.xlu0 %2978 }
0x2cb3   : > { %v2996_v38 = vsel %vm365_vm0, %v5061_v13, %v2979_v27  ;;  %v3806_v13 = vld [vmem:[%s5417_s3 + $0x6] ss:$0 sm:$0xff]  ;;  %vm3170_vm0 = vcmask 392192  }
0x2cb4   : > { %4218 = vmatprep.mubr.msk.f32.mxu0 %vm2396_vm10, %v2996_v38 }
0x2cb5   : > { %4219 = vmatmul.mubr.msk.f32.gmra.mxu0 %vm2396_vm10, %v2997_v39 }
0x2d04   : > { %v4211_v61 = vpop.f32.mrf.mxu0 }
0x2d05   : > { %v3102_v26 = vadd.f32 %v4211_v61, %v3806_v13 }
0x2d06   : > { %v3096_v28 = vpop.f32.mrf.mxu0 }
0x2d07   : > { %v3097_v42 = vadd.f32 %v3806_v13, %v3096_v28  ;;  %v3144_v43 = vmul.f32 0.01, %v3102_v26  ;;  %vm3136_vm13 = vcmp.gt.f32.partialorder %v3102_v26, 0.0 }
0x2d08   : > { %v4214_v44 = vpop.f32.mrf.mxu0 }
0x2d09   : > { %vm3135_vm1 = vcmp.gt.f32.partialorder %v3097_v42, 0.0  ;;  %v3143_v45 = vmul.f32 0.01, %v3097_v42  ;;  %v3112_v46 = vadd.f32 %v4214_v44, %v3806_v13  ;;  %v3152_v18 = vsel %vm3136_vm13, %v3102_v26, %v3144_v43  ;;  %v5299_v44 = vld [vmem:[%s5417_s3 + $0x8] ss:$0 sm:$0xff] }
0x2d0a   : > { %v3106_v49 = vpop.f32.mrf.mxu0 }
0x2d0b   : > { %v3107_v50 = vadd.f32 %v3806_v13, %v3106_v49  ;;  %v3151_v51 = vsel %vm3135_vm1, %v3097_v42, %v3143_v45  ;;  %v3146_v52 = vmul.f32 0.01, %v3112_v46  ;;  %vm3138_vm2 = vcmp.gt.f32.partialorder %v3112_v46, 0.0 }
0x2d0c   : > { %v4217_v53 = vpop.f32.mrf.mxu0  ;;  %4233 = vmatprep.mubr.msk.f32.mxu1 %vm3170_vm0, %v3151_v51 }
0x2d0d   : > { %vm3137_vm3 = vcmp.gt.f32.partialorder %v3107_v50, 0.0  ;;  %v3145_v55 = vmul.f32 0.01, %v3107_v50  ;;  %v3122_v31 = vadd.f32 %v4217_v53, %v3806_v13  ;;  %4234 = vmatmul.mubr.msk.f32.vlgmr.msra.gmra.mxu1 %vm3170_vm0, %v3152_v18  ;;  %v3154_v58 = vsel %vm3138_vm2, %v3112_v46, %v3146_v52 }
0x2d0e   : > { %v3116_v59 = vpop.f32.mrf.mxu0  ;;  %vm3576_vm2 = vcmask 261120  }
0x2d0f   : > { %v3117_v29 = vadd.f32 %v3806_v13, %v3116_v59  ;;  %v3153_v54 = vsel %vm3137_vm3, %v3107_v50, %v3145_v55  ;;  %v3148_v25 = vmul.f32 0.01, %v3122_v31  ;;  %vm3140_vm4 = vcmp.gt.f32.partialorder %v3122_v31, 0.0 }
0x2d10   : > { %4236 = vmatprep.mubr.msk.f32.mxu1 %vm3170_vm0, %v3153_v54  ;;  %vm3585_vm3 = vcmask 326656  }
0x2d11   : > { %vm3139_vm5 = vcmp.gt.f32.partialorder %v3117_v29, 0.0  ;;  %v3147_v21 = vmul.f32 0.01, %v3117_v29  ;;  %4237 = vmatmul.mubr.msk.f32.gmra.mxu1 %vm3170_vm0, %v3154_v58  ;;  %v3156_v2 = vsel %vm3140_vm4, %v3122_v31, %v3148_v25 }
0x2d13   : > { %v3155_v0 = vsel %vm3139_vm5, %v3117_v29, %v3147_v21  ;;  %v3523_v29 = vpop.permute.xlu1 %3522  ;;  %v3521_v21 = vpop.permute.xlu0 %3520 }
0x2d14   : > { %4239 = vmatprep.mubr.msk.f32.mxu1 %vm3170_vm0, %v3155_v0 }
0x2d15   : > { %4240 = vmatmul.mubr.msk.f32.gmra.mxu1 %vm3170_vm0, %v3156_v2 }
0x2d17   : > { %v3527_v5 = vpop.permute.xlu1 %3526  ;;  %v3525_v1 = vpop.permute.xlu0 %3524 }
0x2d75   : > { %v4220_v6 = vpop.f32.mrf.mxu0 }
0x2d76   : > { %v3132_v8 = vadd.f32 %v4220_v6, %v3806_v13 }
0x2d77   : > { %v3126_v9 = vpop.f32.mrf.mxu0 }
0x2d78   : > { %v3127_v10 = vadd.f32 %v3806_v13, %v3126_v9  ;;  %v3150_v15 = vmul.f32 0.01, %v3132_v8  ;;  %vm3142_vm6 = vcmp.gt.f32.partialorder %v3132_v8, 0.0 }
0x2d7a   : > { %vm3141_vm7 = vcmp.gt.f32.partialorder %v3127_v10, 0.0  ;;  %v3149_v17 = vmul.f32 0.01, %v3127_v10  ;;  %v3158_v23 = vsel %vm3142_vm6, %v3132_v8, %v3150_v15 }
0x2d7c   : > { %v3157_v19 = vsel %vm3141_vm7, %v3127_v10, %v3149_v17  ;;  %v3531_v10 = vpop.permute.xlu1 %3530 }
0x2d7d   : > { %4242 = vmatprep.mubr.msk.f32.mxu1 %vm3170_vm0, %v3157_v19  ;;  %v3529_v19 = vpop.permute.xlu0 %3528 }
0x2d7e   : > { %4243 = vmatmul.mubr.msk.f32.gmra.mxu1 %vm3170_vm0, %v3158_v23 }
0x2dcd   : > { %v4235_v32 = vpop.f32.mrf.mxu1 }
0x2dce   : > { %v3267_v33 = vadd.f32 %v4235_v32, %v3815_v24 }
0x2dcf   : > { %v3261_v34 = vpop.f32.mrf.mxu1 }
0x2dd0   : > { %v3262_v35 = vadd.f32 %v3815_v24, %v3261_v34  ;;  %v3309_v36 = vmul.f32 0.01, %v3267_v33  ;;  %vm3301_vm8 = vcmp.gt.f32.partialorder %v3267_v33, 0.0  ;;  %v5307_v34 = vpop.permute.xlu1 %3534 }
0x2dd1   : > { %v4238_v22 = vpop.f32.mrf.mxu1 }
0x2dd2   : > { %vm3300_vm9 = vcmp.gt.f32.partialorder %v3262_v35, 0.0  ;;  %v3308_v14 = vmul.f32 0.01, %v3262_v35  ;;  %v3277_v30 = vadd.f32 %v4238_v22, %v3815_v24  ;;  %v3317_v63 = vsel %vm3301_vm8, %v3267_v33, %v3309_v36  ;;  %v5309_v22 = vpop.permute.xlu0 %3532 }
0x2dd3   : > { %v3271_v3 = vpop.f32.mrf.mxu1 }
0x2dd4   : > { %v3272_v48 = vadd.f32 %v3815_v24, %v3271_v3  ;;  %v3316_v56 = vsel %vm3300_vm9, %v3262_v35, %v3308_v14  ;;  %v3311_v62 = vmul.f32 0.01, %v3277_v30  ;;  %vm3303_vm11 = vcmp.gt.f32.partialorder %v3277_v30, 0.0 }
0x2dd5   : > { %v4241_v37 = vpop.f32.mrf.mxu1  ;;  %4257 = vmatprep.mubr.msk.f32.mxu0 %vm3170_vm0, %v3316_v56 }
0x2dd6   : > { %vm3302_vm12 = vcmp.gt.f32.partialorder %v3272_v48, 0.0  ;;  %v3310_v57 = vmul.f32 0.01, %v3272_v48  ;;  %v3287_v16 = vadd.f32 %v4241_v37, %v3815_v24  ;;  %4258 = vmatmul.mubr.msk.f32.vlgmr.msra.gmra.mxu0 %vm3170_vm0, %v3317_v63  ;;  %v3319_v20 = vsel %vm3303_vm11, %v3277_v30, %v3311_v62  ;;  %v3547_v30 = vpop.permute.xlu1 %3546 }
0x2dd7   : > { %v3281_v40 = vpop.f32.mrf.mxu1 }
0x2dd8   : > { %v3282_v60 = vadd.f32 %v3815_v24, %v3281_v40  ;;  %v3318_v7 = vsel %vm3302_vm12, %v3272_v48, %v3310_v57  ;;  %v3313_v11 = vmul.f32 0.01, %v3287_v16  ;;  %vm3305_vm14 = vcmp.gt.f32.partialorder %v3287_v16, 0.0  ;;  %v3545_v48 = vpop.permute.xlu0 %3544 }
0x2dd9   : > { %4260 = vmatprep.mubr.msk.f32.mxu0 %vm3170_vm0, %v3318_v7 }
0x2dda   : > { %vm3304_vm15 = vcmp.gt.f32.partialorder %v3282_v60, 0.0  ;;  %v3312_v27 = vmul.f32 0.01, %v3282_v60  ;;  %4261 = vmatmul.mubr.msk.f32.gmra.mxu0 %vm3170_vm0, %v3319_v20  ;;  %v3321_v39 = vsel %vm3305_vm14, %v3287_v16, %v3313_v11  ;;  %v3551_v40 = vpop.permute.xlu1 %3550 }
0x2ddc   : > { %v3320_v38 = vsel %vm3304_vm15, %v3282_v60, %v3312_v27 }
0x2ddd   : > { %4263 = vmatprep.mubr.msk.f32.mxu0 %vm3170_vm0, %v3320_v38  ;;  %v3549_v38 = vpop.permute.xlu0 %3548 }
0x2dde   : > { %4264 = vmatmul.mubr.msk.f32.gmra.mxu0 %vm3170_vm0, %v3321_v39 }
0x2e3e   : > { %v4244_v12 = vpop.f32.mrf.mxu1 }
0x2e3f   : > { %v3297_v41 = vadd.f32 %v4244_v12, %v3815_v24 }
0x2e40   : > { %v3291_v13 = vpop.f32.mrf.mxu1 }
0x2e41   : > { %v3292_v61 = vadd.f32 %v3815_v24, %v3291_v13  ;;  %v3315_v26 = vmul.f32 0.01, %v3297_v41  ;;  %vm3307_vm13 = vcmp.gt.f32.partialorder %v3297_v41, 0.0 }
0x2e43   : > { %vm3306_vm1 = vcmp.gt.f32.partialorder %v3292_v61, 0.0  ;;  %v3314_v28 = vmul.f32 0.01, %v3292_v61  ;;  %v3323_v43 = vsel %vm3307_vm13, %v3297_v41, %v3315_v26 }
0x2e45   : > { %v3322_v42 = vsel %vm3306_vm1, %v3292_v61, %v3314_v28 }
0x2e46   : > { %4266 = vmatprep.mubr.msk.f32.mxu0 %vm3170_vm0, %v3322_v42 }
0x2e47   : > { %4267 = vmatmul.mubr.msk.f32.gmra.mxu0 %vm3170_vm0, %v3323_v43 }
0x2e96   : > { %v4259_v45 = vpop.f32.mrf.mxu0 }
0x2e97   : > { %v3431_v46 = vadd.f32 %v4259_v45, %v5299_v44 }
0x2e98   : > { %v3425_v49 = vpop.f32.mrf.mxu0 }
0x2e99   : > { %v3834_v50 = vmul.f32 -1.442695, %v3431_v46  ;;  %v3426_v51 = vadd.f32 %v5299_v44, %v3425_v49  ;;  %v3555_v46 = vpop.permute.xlu1 %3554 }
0x2e9a   : > { %v4262_v18 = vpop.f32.mrf.mxu0 }
0x2e9b   : > { %4464 = vpow2.f32 %v3834_v50  ;;  %v3833_v52 = vmul.f32 -1.442695, %v3426_v51  ;;  %v3441_v53 = vadd.f32 %v4262_v18, %v5299_v44 }
0x2e9c   : > { %v3435_v55 = vpop.f32.mrf.mxu0 }
0x2e9d   : > { %4466 = vpow2.f32 %v3833_v52  ;;  %v3836_v31 = vmul.f32 -1.442695, %v3441_v53  ;;  %v3436_v59 = vadd.f32 %v5299_v44, %v3435_v55  ;;  %v3553_v52 = vpop.permute.xlu0 %3552 }
0x2e9e   : > { %v4265_v54 = vpop.f32.mrf.mxu0 }
0x2e9f   : > { %4468 = vpow2.f32 %v3836_v31  ;;  %v3835_v25 = vmul.f32 -1.442695, %v3436_v59  ;;  %v3451_v58 = vadd.f32 %v4265_v54, %v5299_v44 }
0x2ea0   : > { %v3445_v0 = vpop.f32.mrf.mxu0 }
0x2ea1   : > { %4470 = vpow2.f32 %v3835_v25  ;;  %v3838_v2 = vmul.f32 -1.442695, %v3451_v58  ;;  %v3446_v4 = vadd.f32 %v5299_v44, %v3445_v0 }
0x2ea3   : > { %4472 = vpow2.f32 %v3838_v2  ;;  %v3837_v47 = vmul.f32 -1.442695, %v3446_v4 }
0x2ea5   : > { %4474 = vpow2.f32 %v3837_v47 }
0x2ea8   : > { %v4465_v6 = vpop.eup %4464 }
0x2ea9   : > { %v3489_v8 = vadd.f32 1.0, %v4465_v6 }
0x2eaa   : > { %v4467_v9 = vpop.eup %4466 }
0x2eab   : > { %4476 = vrcp.f32 %v3489_v8  ;;  %v3488_v15 = vadd.f32 1.0, %v4467_v9 }
0x2eac   : > { %v4469_v17 = vpop.eup %4468 }
0x2ead   : > { %4478 = vrcp.f32 %v3488_v15  ;;  %v3491_v23 = vadd.f32 1.0, %v4469_v17  ;;  %v3557_v17 = vpop.permute.xlu0 %3556 }
0x2eae   : > { %v4471_v24 = vpop.eup %4470 }
0x2eaf   : > { %4480 = vrcp.f32 %v3491_v23  ;;  %v3490_v32 = vadd.f32 1.0, %v4471_v24 }
0x2eb0   : > { %v4473_v33 = vpop.eup %4472 }
0x2eb1   : > { %4482 = vrcp.f32 %v3490_v32  ;;  %v3493_v35 = vadd.f32 1.0, %v4473_v33 }
0x2eb2   : > { %v4475_v36 = vpop.eup %4474 }
0x2eb3   : > { %4484 = vrcp.f32 %v3493_v35  ;;  %v3492_v14 = vadd.f32 1.0, %v4475_v36 }
0x2eb5   : > { %4486 = vrcp.f32 %v3492_v14 }
0x2eb8   : > { %v4477_v3 = vpop.eup %4476 }
0x2eb9   : > { %v3569_v56 = vsel %vm2396_vm10, %v4477_v3, %v3523_v29 }
0x2eba   : > { %v4479_v63 = vpop.eup %4478  ;;  %v3578_v62 = vsel %vm3576_vm2, %v3569_v56, %v3523_v29 }
0x2ebb   : > { %v3587_v37 = vsel %vm3585_vm3, %v3578_v62, %v3547_v30  ;;  %v3568_v57 = vsel %vm2396_vm10, %v4479_v63, %v3521_v21 }
0x2ebc   : > { %v4481_v16 = vpop.eup %4480  ;;  %v3595_v60 = vsel %vm3170_vm0, %v3587_v37, 0.0  ;;  %v3577_v7 = vsel %vm3576_vm2, %v3568_v57, %v3521_v21 }
0x2ebd   : > { %3603 = vst [vmem:[%s5318_s13 + $0x8] sm:$0xff] %v3595_v60  ;;  %v3586_v11 = vsel %vm3585_vm3, %v3577_v7, %v3545_v48  ;;  %v3571_v20 = vsel %vm2396_vm10, %v4481_v16, %v3527_v5 }
0x2ebe   : > { %v4483_v27 = vpop.eup %4482  ;;  %v3594_v39 = vsel %vm3170_vm0, %v3586_v11, 0.0  ;;  %v3580_v12 = vsel %vm3576_vm2, %v3571_v20, %v3527_v5 }
0x2ebf   : > { %3602 = vst [vmem:[%s5318_s13] sm:$0xff] %v3594_v39  ;;  %v3589_v41 = vsel %vm3585_vm3, %v3580_v12, %v3551_v40  ;;  %v3570_v13 = vsel %vm2396_vm10, %v4483_v27, %v3525_v1 }
0x2ec0   : > { %v4485_v61 = vpop.eup %4484  ;;  %v3597_v26 = vsel %vm3170_vm0, %v3589_v41, 0.0  ;;  %v3579_v28 = vsel %vm3576_vm2, %v3570_v13, %v3525_v1 }
0x2ec1   : > { %3605 = vst [vmem:[%s5318_s13 + $0x18] sm:$0xff] %v3597_v26  ;;  %v3588_v42 = vsel %vm3585_vm3, %v3579_v28, %v3549_v38  ;;  %v3573_v43 = vsel %vm2396_vm10, %v4485_v61, %v3531_v10 }
0x2ec2   : > { %v4487_v45 = vpop.eup %4486  ;;  %v3596_v49 = vsel %vm3170_vm0, %v3588_v42, 0.0  ;;  %v3582_v50 = vsel %vm3576_vm2, %v3573_v43, %v3531_v10 }
0x2ec3   : > { %3604 = vst [vmem:[%s5318_s13 + $0x10] sm:$0xff] %v3596_v49  ;;  %v3591_v51 = vsel %vm3585_vm3, %v3582_v50, %v3555_v46  ;;  %v3572_v18 = vsel %vm2396_vm10, %v4487_v45, %v3529_v19 }
0x2ec4   : > { %v3599_v53 = vsel %vm3170_vm0, %v3591_v51, 0.0  ;;  %v3581_v55 = vsel %vm3576_vm2, %v3572_v18, %v3529_v19 }
0x2ec5   : > { %3607 = vst [vmem:[%s5318_s13 + $0x28] sm:$0xff] %v3599_v53  ;;  %v3590_v31 = vsel %vm3585_vm3, %v3581_v55, %v3553_v52 }
0x2ec6   : > { %v3598_v59 = vsel %vm3170_vm0, %v3590_v31, 0.0 }
0x2ec7   : > { %3606 = vst [vmem:[%s5318_s13 + $0x20] sm:$0xff] %v3598_v59 }
0x2f07   : > { %v4268_v29 = vpop.f32.mrf.mxu0 }
0x2f08   : > { %v3461_v54 = vadd.f32 %v4268_v29, %v5299_v44 }
0x2f09   : > { %v3455_v25 = vpop.f32.mrf.mxu0 }
0x2f0a   : > { %v3840_v58 = vmul.f32 -1.442695, %v3461_v54  ;;  %v3456_v21 = vadd.f32 %v5299_v44, %v3455_v25  ;;  %v3559_v44 = vpop.permute.xlu1 %3558 }
0x2f0c   : > { %4488 = vpow2.f32 %v3840_v58  ;;  %v3839_v0 = vmul.f32 -1.442695, %v3456_v21 }
0x2f0e   : > { %4490 = vpow2.f32 %v3839_v0 }
0x2f19   : > { %v4489_v2 = vpop.eup %4488 }
0x2f1a   : > { %v3495_v4 = vadd.f32 1.0, %v4489_v2 }
0x2f1b   : > { %v4491_v47 = vpop.eup %4490 }
0x2f1c   : > { %4492 = vrcp.f32 %v3495_v4  ;;  %v3494_v5 = vadd.f32 1.0, %v4491_v47 }
0x2f1e   : > { %4494 = vrcp.f32 %v3494_v5 }
0x2f29   : > { %v4493_v1 = vpop.eup %4492 }
0x2f2a   : > { %v3575_v6 = vsel %vm2396_vm10, %v4493_v1, %v5307_v34 }
0x2f2b   : > { %v4495_v8 = vpop.eup %4494  ;;  %v3584_v9 = vsel %vm3576_vm2, %v3575_v6, %v5307_v34 }
0x2f2c   : > { %v3593_v10 = vsel %vm3585_vm3, %v3584_v9, %v3559_v44  ;;  %v3574_v15 = vsel %vm2396_vm10, %v4495_v8, %v5309_v22 }
0x2f2d   : > { %v3601_v19 = vsel %vm3170_vm0, %v3593_v10, 0.0  ;;  %v3583_v23 = vsel %vm3576_vm2, %v3574_v15, %v5309_v22 }
0x2f2e   : > { %3609 = vst [vmem:[%s5318_s13 + $0x38] sm:$0xff] %v3601_v19  ;;  %v3592_v24 = vsel %vm3585_vm3, %v3583_v23, %v3557_v17 }
0x2f2f   : > { %v3600_v32 = vsel %vm3170_vm0, %v3592_v24, 0.0 }
0x2f30   : > { %3608 = vst [vmem:[%s5318_s13 + $0x30] sm:$0xff] %v3600_v32 }
0x2f31   : > { %4517 = shalt.err (!%p4514_p5)
}
0x2f32   : > { %s4518_s29 = scalar_lea.hbm %s5366_s22, 1024  ;;  %s4522_s28 = scalar_lea.hbm %s5418_s4, 2048 }
0x2f33   : > { %p4519_p7 = scmp.ne.s32.totalorder %s5366_s22, %s4518_s29  ;;  %p4523_p12 = scmp.lt.s32.totalorder %s5366_s22, %s5418_s4 }
0x2f34   : > { %p4524_p13 = scmp.lt.s32.totalorder %s4522_s28, %s4518_s29 }
0x2f35   : > { %p4520_p10 = pnand %p4519_p7, %p4646_p6 }
0x2f36   : > { %p4525_p0 = por %p4524_p13, %p4523_p12 }
0x2f37   : > { %p4521_p11 = pneg %p4520_p10 }
0x2f39   : > { %p4526_p1 = pnand %p4525_p0, %p4521_p11 }
0x2f3b   : > { %4529 = shalt.err (!%p4526_p1)
}
0x2f3c   : > { %s4577_s13 = smov 128   ;;  %s4578_s14 = smov 256  }
0x2f3d   : > { %4269 = dma.vmem_to_hbm [thread:$0]  (%p4646_p6), %s5356_s30, 1024, %s5366_s22, %s5372_s23, %s4577_s13, %s4578_s14, %s4572_s6  }
0x2f3e PF: > { %s3638_s19 = sand.u32 1, %s4552_s15   ;;  %p4272_p2 = pnand %p3711_p9, %p4650_p8 }
0x2f3f   : > { %s3639_s20 = scalar_lea.sflag [#allocation5], %s3638_s19 }
0x2f40   : > { %p4273_p3 = pneg %p4272_p2 }
0x2f42   : > { %4547 = dma.done.wait (%p4273_p3), %s3639_s20, 1024  }
0x2f43   : > { %4549 = vsyncadd (%p4273_p3), %s3639_s20, 4294966272  ;;  %p14_p4 = scmp.ge.s32.totalorder %s4627_s21, 4   ;;  %s5422_s15 = smov %s4556_s16 }
0x2f44   : > { %s5423_s16 = smov %s4560_s17  ;;  %s5424_s17 = smov %s4640_s24 }
0x2f45   : > { %s5425_s18 = smov %s4627_s21  ;;  %16 = sbr.rel (!%p14_p4) target bundleno = 3 (0x3), region = 160 }
0x2f4a   :  { %3644 = vsyncpa [#allocation5], 1 }
0x2f4b   :  { %3646 = vsyncpa [#allocation5 + $0x1], 1 }

</bundles_post_ra>
